<compile_context>
chip_gen: v7x
topology: tpu7x:2x2x1
jax: 0.10.0
libtpu: 0.0.40
codegen_flags: <defaults>
</compile_context>

<pallas_src>
import functools

import jax
import jax.numpy as jnp
from jax.experimental import pallas as pl
from jax.experimental.pallas import tpu as pltpu


# ----------------------------------------------------------------------------
# Kernels
# ----------------------------------------------------------------------------
def _matmul_bias_act_kernel(p_ref, w_ref, b_ref, o_ref, *, apply_relu):
    """o = p @ w + b (optional ReLU); whole tiles resident in VMEM."""
    y = jnp.dot(p_ref[...], w_ref[...], preferred_element_type=jnp.float32)
    y = y + b_ref[...]
    if apply_relu:
        y = jnp.maximum(y, 0.0)
    o_ref[...] = y.astype(o_ref.dtype)


def _head_gru_kernel(feat_ref, goal_ref, h_ref, mask_ref,
                     wfc_ref, bfc_ref,
                     wih_p_ref, wih_g_ref, whh_ref, bih_ref, bhh_ref,
                     out_ref, hout_ref, *, hidden):
    """Fused: SimpleCNN final Linear+ReLU -> concat with goal -> masked GRU step."""
    H = hidden

    # perception embedding = ReLU(flattened_cnn @ W_fc + b_fc)
    perc = jnp.dot(feat_ref[...], wfc_ref[...],
                   preferred_element_type=jnp.float32) + bfc_ref[...]
    perc = jnp.maximum(perc, 0.0)

    goal = goal_ref[...]
    # RNNStateEncoder masks the hidden state before the GRU step.
    h = h_ref[...] * mask_ref[...]

    # x = concat([perc, goal], 1); x @ W_ih^T is computed as two split matmuls
    # so no lane-dim concatenation is needed inside the kernel.
    gi = (jnp.dot(perc, wih_p_ref[...], preferred_element_type=jnp.float32)
          + jnp.dot(goal, wih_g_ref[...], preferred_element_type=jnp.float32)
          + bih_ref[...])
    gh = jnp.dot(h, whh_ref[...], preferred_element_type=jnp.float32) + bhh_ref[...]

    # PyTorch GRU gate order: [r, z, n]
    r = 1.0 / (1.0 + jnp.exp(-(gi[:, 0:H] + gh[:, 0:H])))
    z = 1.0 / (1.0 + jnp.exp(-(gi[:, H:2 * H] + gh[:, H:2 * H])))
    n = jnp.tanh(gi[:, 2 * H:3 * H] + r * gh[:, 2 * H:3 * H])
    h_new = (1.0 - z) * n + z * h

    out_ref[...] = h_new.astype(out_ref.dtype)
    hout_ref[...] = h_new.astype(hout_ref.dtype)


# ----------------------------------------------------------------------------
# Wrappers
# ----------------------------------------------------------------------------
def _full_spec(shape):
    zeros = (0,) * len(shape)
    return pl.BlockSpec(shape, lambda *_: zeros)


def _im2col(x, kh, kw, sh, sw):
    """NHWC -> (B*OH*OW, kh*kw*C) patches.  Pure layout, no FLOPs.
    # TODO(synk): the strided window gather has no clean in-kernel Pallas form
    # at these shapes; it stays in the wrapper and only the GEMM runs in-kernel.
    """
    B, H, W, C = x.shape
    OH = (H - kh) // sh + 1
    OW = (W - kw) // sw + 1
    rows = []
    for iy in range(kh):
        cols = []
        for ix in range(kw):
            sl = x[:, iy: iy + sh * (OH - 1) + 1: sh,
                   ix: ix + sw * (OW - 1) + 1: sw, :]        # (B, OH, OW, C)
            cols.append(sl)
        rows.append(jnp.stack(cols, axis=3))                  # (B, OH, OW, kw, C)
    patches = jnp.stack(rows, axis=3)                         # (B, OH, OW, kh, kw, C)
    return patches.reshape(B * OH * OW, kh * kw * C), OH, OW


def _conv_matmul(patches, w2d, b, apply_relu):
    M, K = patches.shape
    N = w2d.shape[1]
    b2 = b.reshape(1, N).astype(jnp.float32)
    kernel = functools.partial(_matmul_bias_act_kernel, apply_relu=apply_relu)
    return pl.pallas_call(
        kernel,
        out_shape=jax.ShapeDtypeStruct((M, N), jnp.float32),
        grid_spec=pltpu.PrefetchScalarGridSpec(
            num_scalar_prefetch=0,
            grid=(),
            in_specs=[_full_spec((M, K)), _full_spec((K, N)), _full_spec((1, N))],
            out_specs=_full_spec((M, N)),
        ),
    )(patches.astype(jnp.float32), w2d.astype(jnp.float32), b2)


def _head_gru(feat, goal, h_prev, masks, params, hidden):
    B, F = feat.shape
    G = goal.shape[1]
    H = hidden
    wih = params["gru_wih"]                  # (H + G, 3H), pre-transposed vs torch
    wih_p, wih_g = wih[:H], wih[H:]
    kernel = functools.partial(_head_gru_kernel, hidden=H)
    return pl.pallas_call(
        kernel,
        out_shape=(jax.ShapeDtypeStruct((B, H), jnp.float32),
                   jax.ShapeDtypeStruct((B, H), jnp.float32)),
        grid_spec=pltpu.PrefetchScalarGridSpec(
            num_scalar_prefetch=0,
            grid=(),
            in_specs=[
                _full_spec((B, F)),
                _full_spec((B, G)),
                _full_spec((B, H)),
                _full_spec((B, 1)),
                _full_spec((F, H)),
                _full_spec((1, H)),
                _full_spec((H, 3 * H)),
                _full_spec((G, 3 * H)),
                _full_spec((H, 3 * H)),
                _full_spec((1, 3 * H)),
                _full_spec((1, 3 * H)),
            ],
            out_specs=[_full_spec((B, H)), _full_spec((B, H))],
        ),
    )(feat, goal, h_prev, masks,
      params["fc_w"], params["fc_b"].reshape(1, H),
      wih_p, wih_g, params["gru_whh"],
      params["gru_bih"].reshape(1, 3 * H), params["gru_bhh"].reshape(1, 3 * H))


# SimpleCNN layer config: (kernel, stride, relu-after-conv)
_CNN_LAYERS = (((8, 8), (4, 4), True),
               ((4, 4), (2, 2), True),
               ((3, 3), (1, 1), False))


def pointnav_baseline_net_forward(params, observations, rnn_hidden_states,
                                  prev_actions, masks, hidden_size):
    # prev_actions is accepted but unused, exactly as in the PyTorch module.
    del prev_actions
    depth = observations["depth"].astype(jnp.float32)                        # (B, H, W, 1)
    goal = observations["pointgoal_with_gps_compass"].astype(jnp.float32)    # (B, G)
    B = depth.shape[0]

    # SimpleCNN conv stack: each conv = im2col + fused GEMM/bias/ReLU kernel.
    x = depth
    for li, ((kh, kw), (sh, sw), relu) in enumerate(_CNN_LAYERS):
        w4 = params[f"conv{li}_w"]                      # (kh, kw, Cin, Cout), HWIO
        cout = w4.shape[3]
        patches, OH, OW = _im2col(x, kh, kw, sh, sw)
        y = _conv_matmul(patches, w4.reshape(kh * kw * w4.shape[2], cout),
                         params[f"conv{li}_b"], relu)
        x = y.reshape(B, OH, OW, cout)

    # Flatten (NHWC order; equivalent to PyTorch's NCHW flatten up to a fixed
    # permutation of the FC weight columns, which these params are defined in).
    feat = x.reshape(B, -1)

    h_prev = rnn_hidden_states.reshape(B, hidden_size).astype(jnp.float32)
    out, h_new = _head_gru(feat, goal, h_prev, masks.astype(jnp.float32),
                           params, hidden_size)
    return out, h_new.reshape(1, B, hidden_size)


# ----------------------------------------------------------------------------
# Params + pure-JAX reference (same math as the PyTorch forward)
# ----------------------------------------------------------------------------
def make_params(key, hidden_size, n_goal, in_channels, cnn_flat_dim):
    ks = jax.random.split(key, 9)

    def nrm(k, shape, scale):
        return scale * jax.random.normal(k, shape, dtype=jnp.float32)

    return {
        "conv0_w": nrm(ks[0], (8, 8, in_channels, 32), 0.10),
        "conv0_b": jnp.zeros((32,), jnp.float32),
        "conv1_w": nrm(ks[1], (4, 4, 32, 64), 0.05),
        "conv1_b": jnp.zeros((64,), jnp.float32),
        "conv2_w": nrm(ks[2], (3, 3, 64, 32), 0.05),
        "conv2_b": jnp.zeros((32,), jnp.float32),
        "fc_w": nrm(ks[3], (cnn_flat_dim, hidden_size), 0.05),
        "fc_b": nrm(ks[4], (hidden_size,), 0.01),
        "gru_wih": nrm(ks[5], (hidden_size + n_goal, 3 * hidden_size), 0.10),
        "gru_whh": nrm(ks[6], (hidden_size, 3 * hidden_size), 0.10),
        "gru_bih": nrm(ks[7], (3 * hidden_size,), 0.01),
        "gru_bhh": nrm(ks[8], (3 * hidden_size,), 0.01),
    }


def reference_forward(params, observations, rnn_hidden_states, prev_actions,
                      masks, hidden_size):
    del prev_actions
    depth = observations["depth"].astype(jnp.float32)
    goal = observations["pointgoal_with_gps_compass"].astype(jnp.float32)
    B = depth.shape[0]
    H = hidden_size

    x = depth
    for li, ((kh, kw), (sh, sw), relu) in enumerate(_CNN_LAYERS):
        x = jax.lax.conv_general_dilated(
            x, params[f"conv{li}_w"], window_strides=(sh, sw), padding="VALID",
            dimension_numbers=("NHWC", "HWIO", "NHWC"),
            precision=jax.lax.Precision.HIGHEST)
        x = x + params[f"conv{li}_b"].reshape(1, 1, 1, -1)
        if relu:
            x = jnp.maximum(x, 0.0)
    feat = x.reshape(B, -1)

    hp = jax.lax.Precision.HIGHEST
    perc = jnp.maximum(jnp.dot(feat, params["fc_w"], precision=hp) + params["fc_b"], 0.0)
    xcat = jnp.concatenate([perc, goal], axis=1)

    h = rnn_hidden_states.reshape(B, H) * masks
    gi = jnp.dot(xcat, params["gru_wih"], precision=hp) + params["gru_bih"]
    gh = jnp.dot(h, params["gru_whh"], precision=hp) + params["gru_bhh"]
    r = jax.nn.sigmoid(gi[:, :H] + gh[:, :H])
    z = jax.nn.sigmoid(gi[:, H:2 * H] + gh[:, H:2 * H])
    n = jnp.tanh(gi[:, 2 * H:] + r * gh[:, 2 * H:])
    h_new = (1.0 - z) * n + z * h
    return h_new, h_new.reshape(1, B, H)


# ----------------------------------------------------------------------------
if __name__ == "__main__":
    key = jax.random.PRNGKey(0)
    k_d, k_g, k_h, k_p = jax.random.split(key, 4)

    batch = 2
    hidden_size = 32
    img = 64          # smallest image the SimpleCNN stack supports is 36x36
    n_goal = 2
    # conv output spatial dims: 64 -> 15 -> 6 -> 4, final 32 channels => 512 flat
    cnn_flat_dim = 4 * 4 * 32

    observations = {
        "depth": jax.random.uniform(k_d, (batch, img, img, 1), dtype=jnp.float32),
        "pointgoal_with_gps_compass": jax.random.normal(
            k_g, (batch, n_goal), dtype=jnp.float32),
    }
    rnn_hidden_states = 0.1 * jax.random.normal(
        k_h, (1, batch, hidden_size), dtype=jnp.float32)
    prev_actions = jnp.zeros((batch, 2), jnp.float32)   # unused by the module
    masks = jnp.array([[1.0], [0.0]], jnp.float32)

    params = make_params(k_p, hidden_size, n_goal, 1, cnn_flat_dim)

    fwd = jax.jit(functools.partial(pointnav_baseline_net_forward,
                                    hidden_size=hidden_size))
    out, h_new = fwd(params, observations, rnn_hidden_states, prev_actions, masks)
    out = jax.block_until_ready(out)
    h_new = jax.block_until_ready(h_new)

    ref_out, ref_h = reference_forward(params, observations, rnn_hidden_states,
                                       prev_actions, masks, hidden_size)

    assert out.shape == (batch, hidden_size)
    assert h_new.shape == (1, batch, hidden_size)
    assert jnp.allclose(out, ref_out, atol=2e-3, rtol=2e-3), \
        float(jnp.max(jnp.abs(out - ref_out)))
    assert jnp.allclose(h_new, ref_h, atol=2e-3, rtol=2e-3)

    print("KERNEL_OK")
</pallas_src>

<mosaic_0001>
module attributes {stable_mosaic.version = 11 : i64} {
  func.func @_matmul_bias_act_kernel(%arg0: memref<450x64xf32, #tpu.memory_space<vmem>>, %arg1: memref<64x32xf32, #tpu.memory_space<vmem>>, %arg2: memref<1x32xf32, #tpu.memory_space<vmem>>, %arg3: memref<450x32xf32, #tpu.memory_space<vmem>>) attributes {dimension_semantics = [], scalar_prefetch = 0 : i64, scratch_operands = 0 : i64, tpu.core_type = #tpu.core_type<tc>} {
    %c0 = arith.constant 0 : index
    %c0_0 = arith.constant 0 : index
    %0 = vector.load %arg0[%c0, %c0_0] : memref<450x64xf32, #tpu.memory_space<vmem>>, vector<450x64xf32>
    %c0_1 = arith.constant 0 : index
    %c0_2 = arith.constant 0 : index
    %1 = vector.load %arg1[%c0_1, %c0_2] : memref<64x32xf32, #tpu.memory_space<vmem>>, vector<64x32xf32>
    %cst = arith.constant dense<0.000000e+00> : vector<450x32xf32>
    %2 = tpu.matmul %0, %1, %cst {dimension_numbers = #tpu.dot_dimension_numbers<[1], [0], [0], [1], [0, 0, 1, 1], [], []>} : vector<450x64xf32>, vector<64x32xf32>, vector<450x32xf32> -> vector<450x32xf32>
    %c0_3 = arith.constant 0 : index
    %c0_4 = arith.constant 0 : index
    %3 = vector.load %arg2[%c0_3, %c0_4] : memref<1x32xf32, #tpu.memory_space<vmem>>, vector<1x32xf32>
    %4 = vector.broadcast %3 : vector<1x32xf32> to vector<450x32xf32>
    %5 = arith.addf %2, %4 : vector<450x32xf32>
    %cst_5 = arith.constant 0.000000e+00 : f32
    %6 = vector.broadcast %cst_5 : f32 to vector<450x32xf32>
    %7 = arith.maximumf %5, %6 : vector<450x32xf32>
    %c0_6 = arith.constant 0 : index
    %c0_7 = arith.constant 0 : index
    %8 = vector.load %arg3[%c0_6, %c0_7] : memref<450x32xf32, #tpu.memory_space<vmem>>, vector<450x32xf32>
    tpu.vector_store %arg3[%c0_6, %c0_7], %7 {strides = array<i32>} : memref<450x32xf32, #tpu.memory_space<vmem>>, vector<450x32xf32>,
    return
  }
}

module attributes {stable_mosaic.version = 11 : i64} {
  func.func @_matmul_bias_act_kernel(%arg0: memref<72x512xf32, #tpu.memory_space<vmem>>, %arg1: memref<512x64xf32, #tpu.memory_space<vmem>>, %arg2: memref<1x64xf32, #tpu.memory_space<vmem>>, %arg3: memref<72x64xf32, #tpu.memory_space<vmem>>) attributes {dimension_semantics = [], scalar_prefetch = 0 : i64, scratch_operands = 0 : i64, tpu.core_type = #tpu.core_type<tc>} {
    %c0 = arith.constant 0 : index
    %c0_0 = arith.constant 0 : index
    %0 = vector.load %arg0[%c0, %c0_0] : memref<72x512xf32, #tpu.memory_space<vmem>>, vector<72x512xf32>
    %c0_1 = arith.constant 0 : index
    %c0_2 = arith.constant 0 : index
    %1 = vector.load %arg1[%c0_1, %c0_2] : memref<512x64xf32, #tpu.memory_space<vmem>>, vector<512x64xf32>
    %cst = arith.constant dense<0.000000e+00> : vector<72x64xf32>
    %2 = tpu.matmul %0, %1, %cst {dimension_numbers = #tpu.dot_dimension_numbers<[1], [0], [0], [1], [0, 0, 1, 1], [], []>} : vector<72x512xf32>, vector<512x64xf32>, vector<72x64xf32> -> vector<72x64xf32>
    %c0_3 = arith.constant 0 : index
    %c0_4 = arith.constant 0 : index
    %3 = vector.load %arg2[%c0_3, %c0_4] : memref<1x64xf32, #tpu.memory_space<vmem>>, vector<1x64xf32>
    %4 = vector.broadcast %3 : vector<1x64xf32> to vector<72x64xf32>
    %5 = arith.addf %2, %4 : vector<72x64xf32>
    %cst_5 = arith.constant 0.000000e+00 : f32
    %6 = vector.broadcast %cst_5 : f32 to vector<72x64xf32>
    %7 = arith.maximumf %5, %6 : vector<72x64xf32>
    %c0_6 = arith.constant 0 : index
    %c0_7 = arith.constant 0 : index
    %8 = vector.load %arg3[%c0_6, %c0_7] : memref<72x64xf32, #tpu.memory_space<vmem>>, vector<72x64xf32>
    tpu.vector_store %arg3[%c0_6, %c0_7], %7 {strides = array<i32>} : memref<72x64xf32, #tpu.memory_space<vmem>>, vector<72x64xf32>,
    return
  }
}

module attributes {stable_mosaic.version = 11 : i64} {
  func.func @_matmul_bias_act_kernel(%arg0: memref<32x576xf32, #tpu.memory_space<vmem>>, %arg1: memref<576x32xf32, #tpu.memory_space<vmem>>, %arg2: memref<1x32xf32, #tpu.memory_space<vmem>>, %arg3: memref<32x32xf32, #tpu.memory_space<vmem>>) attributes {dimension_semantics = [], scalar_prefetch = 0 : i64, scratch_operands = 0 : i64, tpu.core_type = #tpu.core_type<tc>} {
    %c0 = arith.constant 0 : index
    %c0_0 = arith.constant 0 : index
    %0 = vector.load %arg0[%c0, %c0_0] : memref<32x576xf32, #tpu.memory_space<vmem>>, vector<32x576xf32>
    %c0_1 = arith.constant 0 : index
    %c0_2 = arith.constant 0 : index
    %1 = vector.load %arg1[%c0_1, %c0_2] : memref<576x32xf32, #tpu.memory_space<vmem>>, vector<576x32xf32>
    %cst = arith.constant dense<0.000000e+00> : vector<32x32xf32>
    %2 = tpu.matmul %0, %1, %cst {dimension_numbers = #tpu.dot_dimension_numbers<[1], [0], [0], [1], [0, 0, 1, 1], [], []>} : vector<32x576xf32>, vector<576x32xf32>, vector<32x32xf32> -> vector<32x32xf32>
    %c0_3 = arith.constant 0 : index
    %c0_4 = arith.constant 0 : index
    %3 = vector.load %arg2[%c0_3, %c0_4] : memref<1x32xf32, #tpu.memory_space<vmem>>, vector<1x32xf32>
    %4 = vector.broadcast %3 : vector<1x32xf32> to vector<32x32xf32>
    %5 = arith.addf %2, %4 : vector<32x32xf32>
    %c0_5 = arith.constant 0 : index
    %c0_6 = arith.constant 0 : index
    %6 = vector.load %arg3[%c0_5, %c0_6] : memref<32x32xf32, #tpu.memory_space<vmem>>, vector<32x32xf32>
    tpu.vector_store %arg3[%c0_5, %c0_6], %5 {strides = array<i32>} : memref<32x32xf32, #tpu.memory_space<vmem>>, vector<32x32xf32>,
    return
  }
}

module attributes {stable_mosaic.version = 11 : i64} {
  func.func @_head_gru_kernel(%arg0: memref<2x512xf32, #tpu.memory_space<vmem>>, %arg1: memref<2x2xf32, #tpu.memory_space<vmem>>, %arg2: memref<2x32xf32, #tpu.memory_space<vmem>>, %arg3: memref<2x1xf32, #tpu.memory_space<vmem>>, %arg4: memref<512x32xf32, #tpu.memory_space<vmem>>, %arg5: memref<1x32xf32, #tpu.memory_space<vmem>>, %arg6: memref<32x96xf32, #tpu.memory_space<vmem>>, %arg7: memref<2x96xf32, #tpu.memory_space<vmem>>, %arg8: memref<32x96xf32, #tpu.memory_space<vmem>>, %arg9: memref<1x96xf32, #tpu.memory_space<vmem>>, %arg10: memref<1x96xf32, #tpu.memory_space<vmem>>, %arg11: memref<2x32xf32, #tpu.memory_space<vmem>>, %arg12: memref<2x32xf32, #tpu.memory_space<vmem>>) attributes {dimension_semantics = [], scalar_prefetch = 0 : i64, scratch_operands = 0 : i64, tpu.core_type = #tpu.core_type<tc>} {
    %c0 = arith.constant 0 : index
    %c0_0 = arith.constant 0 : index
    %0 = vector.load %arg0[%c0, %c0_0] : memref<2x512xf32, #tpu.memory_space<vmem>>, vector<2x512xf32>
    %c0_1 = arith.constant 0 : index
    %c0_2 = arith.constant 0 : index
    %1 = vector.load %arg4[%c0_1, %c0_2] : memref<512x32xf32, #tpu.memory_space<vmem>>, vector<512x32xf32>
    %cst = arith.constant dense<0.000000e+00> : vector<2x32xf32>
    %2 = tpu.matmul %0, %1, %cst {dimension_numbers = #tpu.dot_dimension_numbers<[1], [0], [0], [1], [0, 0, 1, 1], [], []>} : vector<2x512xf32>, vector<512x32xf32>, vector<2x32xf32> -> vector<2x32xf32>
    %c0_3 = arith.constant 0 : index
    %c0_4 = arith.constant 0 : index
    %3 = vector.load %arg5[%c0_3, %c0_4] : memref<1x32xf32, #tpu.memory_space<vmem>>, vector<1x32xf32>
    %4 = vector.broadcast %3 : vector<1x32xf32> to vector<2x32xf32>
    %5 = arith.addf %2, %4 : vector<2x32xf32>
    %cst_5 = arith.constant 0.000000e+00 : f32
    %6 = vector.broadcast %cst_5 : f32 to vector<2x32xf32>
    %7 = arith.maximumf %5, %6 : vector<2x32xf32>
    %c0_6 = arith.constant 0 : index
    %c0_7 = arith.constant 0 : index
    %8 = vector.load %arg1[%c0_6, %c0_7] : memref<2x2xf32, #tpu.memory_space<vmem>>, vector<2x2xf32>
    %c0_8 = arith.constant 0 : index
    %c0_9 = arith.constant 0 : index
    %9 = vector.load %arg2[%c0_8, %c0_9] : memref<2x32xf32, #tpu.memory_space<vmem>>, vector<2x32xf32>
    %c0_10 = arith.constant 0 : index
    %c0_11 = arith.constant 0 : index
    %10 = vector.load %arg3[%c0_10, %c0_11] : memref<2x1xf32, #tpu.memory_space<vmem>>, vector<2x1xf32>
    %11 = vector.broadcast %10 : vector<2x1xf32> to vector<2x32xf32>
    %12 = arith.mulf %9, %11 : vector<2x32xf32>
    %c0_12 = arith.constant 0 : index
    %c0_13 = arith.constant 0 : index
    %13 = vector.load %arg6[%c0_12, %c0_13] : memref<32x96xf32, #tpu.memory_space<vmem>>, vector<32x96xf32>
    %cst_14 = arith.constant dense<0.000000e+00> : vector<2x96xf32>
    %14 = tpu.matmul %7, %13, %cst_14 {dimension_numbers = #tpu.dot_dimension_numbers<[1], [0], [0], [1], [0, 0, 1, 1], [], []>} : vector<2x32xf32>, vector<32x96xf32>, vector<2x96xf32> -> vector<2x96xf32>
    %c0_15 = arith.constant 0 : index
    %c0_16 = arith.constant 0 : index
    %15 = vector.load %arg7[%c0_15, %c0_16] : memref<2x96xf32, #tpu.memory_space<vmem>>, vector<2x96xf32>
    %cst_17 = arith.constant dense<0.000000e+00> : vector<2x96xf32>
    %16 = tpu.matmul %8, %15, %cst_17 {dimension_numbers = #tpu.dot_dimension_numbers<[1], [0], [0], [1], [0, 0, 1, 1], [], []>} : vector<2x2xf32>, vector<2x96xf32>, vector<2x96xf32> -> vector<2x96xf32>
    %17 = arith.addf %14, %16 : vector<2x96xf32>
    %c0_18 = arith.constant 0 : index
    %c0_19 = arith.constant 0 : index
    %18 = vector.load %arg9[%c0_18, %c0_19] : memref<1x96xf32, #tpu.memory_space<vmem>>, vector<1x96xf32>
    %19 = vector.broadcast %18 : vector<1x96xf32> to vector<2x96xf32>
    %20 = arith.addf %17, %19 : vector<2x96xf32>
    %c0_20 = arith.constant 0 : index
    %c0_21 = arith.constant 0 : index
    %21 = vector.load %arg8[%c0_20, %c0_21] : memref<32x96xf32, #tpu.memory_space<vmem>>, vector<32x96xf32>
    %cst_22 = arith.constant dense<0.000000e+00> : vector<2x96xf32>
    %22 = tpu.matmul %12, %21, %cst_22 {dimension_numbers = #tpu.dot_dimension_numbers<[1], [0], [0], [1], [0, 0, 1, 1], [], []>} : vector<2x32xf32>, vector<32x96xf32>, vector<2x96xf32> -> vector<2x96xf32>
    %c0_23 = arith.constant 0 : index
    %c0_24 = arith.constant 0 : index
    %23 = vector.load %arg10[%c0_23, %c0_24] : memref<1x96xf32, #tpu.memory_space<vmem>>, vector<1x96xf32>
    %24 = vector.broadcast %23 : vector<1x96xf32> to vector<2x96xf32>
    %25 = arith.addf %22, %24 : vector<2x96xf32>
    %26 = vector.extract_strided_slice %20 {offsets = [0, 0], sizes = [2, 32], strides = [1, 1]} : vector<2x96xf32> to vector<2x32xf32>
    %27 = vector.extract_strided_slice %25 {offsets = [0, 0], sizes = [2, 32], strides = [1, 1]} : vector<2x96xf32> to vector<2x32xf32>
    %28 = arith.addf %26, %27 : vector<2x32xf32>
    %cst_25 = arith.constant 0.000000e+00 : f32
    %29 = vector.broadcast %cst_25 : f32 to vector<2x32xf32>
    %30 = arith.subf %29, %28 : vector<2x32xf32>
    %31 = math.exp %30 : vector<2x32xf32>
    %cst_26 = arith.constant 1.000000e+00 : f32
    %32 = vector.broadcast %cst_26 : f32 to vector<2x32xf32>
    %33 = arith.addf %32, %31 : vector<2x32xf32>
    %cst_27 = arith.constant 1.000000e+00 : f32
    %34 = vector.broadcast %cst_27 : f32 to vector<2x32xf32>
    %35 = arith.divf %34, %33 : vector<2x32xf32>
    %36 = vector.extract_strided_slice %20 {offsets = [0, 32], sizes = [2, 32], strides = [1, 1]} : vector<2x96xf32> to vector<2x32xf32>
    %37 = vector.extract_strided_slice %25 {offsets = [0, 32], sizes = [2, 32], strides = [1, 1]} : vector<2x96xf32> to vector<2x32xf32>
    %38 = arith.addf %36, %37 : vector<2x32xf32>
    %cst_28 = arith.constant 0.000000e+00 : f32
    %39 = vector.broadcast %cst_28 : f32 to vector<2x32xf32>
    %40 = arith.subf %39, %38 : vector<2x32xf32>
    %41 = math.exp %40 : vector<2x32xf32>
    %cst_29 = arith.constant 1.000000e+00 : f32
    %42 = vector.broadcast %cst_29 : f32 to vector<2x32xf32>
    %43 = arith.addf %42, %41 : vector<2x32xf32>
    %cst_30 = arith.constant 1.000000e+00 : f32
    %44 = vector.broadcast %cst_30 : f32 to vector<2x32xf32>
    %45 = arith.divf %44, %43 : vector<2x32xf32>
    %46 = vector.extract_strided_slice %20 {offsets = [0, 64], sizes = [2, 32], strides = [1, 1]} : vector<2x96xf32> to vector<2x32xf32>
    %47 = vector.extract_strided_slice %25 {offsets = [0, 64], sizes = [2, 32], strides = [1, 1]} : vector<2x96xf32> to vector<2x32xf32>
    %48 = arith.mulf %35, %47 : vector<2x32xf32>
    %49 = arith.addf %46, %48 : vector<2x32xf32>
    %50 = math.tanh %49 : vector<2x32xf32>
    %cst_31 = arith.constant 1.000000e+00 : f32
    %51 = vector.broadcast %cst_31 : f32 to vector<2x32xf32>
    %52 = arith.subf %51, %45 : vector<2x32xf32>
    %53 = arith.mulf %52, %50 : vector<2x32xf32>
    %54 = arith.mulf %45, %12 : vector<2x32xf32>
    %55 = arith.addf %53, %54 : vector<2x32xf32>
    %c0_32 = arith.constant 0 : index
    %c0_33 = arith.constant 0 : index
    %56 = vector.load %arg11[%c0_32, %c0_33] : memref<2x32xf32, #tpu.memory_space<vmem>>, vector<2x32xf32>
    tpu.vector_store %arg11[%c0_32, %c0_33], %55 {strides = array<i32>} : memref<2x32xf32, #tpu.memory_space<vmem>>, vector<2x32xf32>,
    %c0_34 = arith.constant 0 : index
    %c0_35 = arith.constant 0 : index
    %57 = vector.load %arg12[%c0_34, %c0_35] : memref<2x32xf32, #tpu.memory_space<vmem>>, vector<2x32xf32>
    tpu.vector_store %arg12[%c0_34, %c0_35], %55 {strides = array<i32>} : memref<2x32xf32, #tpu.memory_space<vmem>>, vector<2x32xf32>,
    return
  }
}

</mosaic_0001>

<bundles_post_ra>
// kernel: pointnav_baseline_net_forward.4
= control target key start
LH: loop header
LB: loop body
LE: loop exit
PB: predicated region body
PF: predicated region fallthrough
CT: control target
= control target key end

     0   :  { %v1061_v0 = vmov 0.0|0.0   ;;  %vm1062_vm0 = vmmov 0   ;;  %v1063_v6 = vmov 0.0   ;;  %vm86_vm1 = vcmask 523264   ;;  %s1739_s1 = inlined_call_operand.vmem [shape: f32[64,32], index: 1, kind: input, shape index: {}]   ;;  %s1740_s0 = inlined_call_operand.vmem [shape: f32[450,64], index: 0, kind: input, shape index: {}]   ;;  %s1741_s2 = inlined_call_operand.vmem [shape: f32[1,32], index: 2, kind: input, shape index: {}]   ;;  %s1742_s3 = inlined_call_operand.vmem [shape: f32[450,32], index: 3, kind: output, shape index: {}]  }
   0x1   :  { %1038 = vmatprep.subr.bf16.mxu0 %v1061_v0  ;;  %v71_v1 = vld [vmem:[%s1739_s1] sm:$0xff]  ;;  %v72_v2 = vld [vmem:[%s1739_s1 + $0x8] sm:$0xff]  ;;  %1050 = vmatprep.subr.bf16.mxu1 %v1061_v0  ;;  %v73_v3 = vld [vmem:[%s1739_s1 + $0x10] sm:$0xff]  ;;  %vm665_vm2 = vcmask 261120   ;;  %vm722_vm3 = vcmask 254976  }
   0x2   :  { %v1039_v4 = vpack.c.bf16 %v72_v2, %v71_v1  ;;  %v74_v5 = vld [vmem:[%s1739_s1 + $0x18] sm:$0xff]  ;;  %867 = vmatprep.mubr.msk.f32.mxu0 %vm1062_vm0, %v1063_v6  ;;  %954 = vmatprep.mubr.msk.f32.mxu1 %vm1062_vm0, %v1063_v6  ;;  %v75_v8 = vld [vmem:[%s1739_s1 + $0x20] sm:$0xff]  ;;  %v76_v9 = vld [vmem:[%s1739_s1 + $0x28] sm:$0xff] }
   0x3   :  { %v1042_v7 = vpack.c.bf16 %v74_v5, %v73_v3  ;;  %v1045_v10 = vpack.c.bf16 %v76_v9, %v75_v8  ;;  %v77_v11 = vld [vmem:[%s1739_s1 + $0x30] sm:$0xff]  ;;  %v78_v12 = vld [vmem:[%s1739_s1 + $0x38] sm:$0xff]  ;;  %v14_v14 = vld [vmem:[%s1740_s0] sm:$0xff] }
   0x4   :  { %1040 = vmatpush3.bf16.msra.mxu0 %v1039_v4  ;;  %1054 = vmatpush3.bf16.msra.mxu1 %v1039_v4  ;;  %v1048_v13 = vpack.c.bf16 %v78_v12, %v77_v11  ;;  %v43_v15 = vld [vmem:[%s1740_s0 + $0xe8] sm:$0xff]  ;;  %v44_v17 = vld [vmem:[%s1740_s0 + $0xf0] sm:$0xff]  ;;  %v45_v19 = vld [vmem:[%s1740_s0 + $0xf8] sm:$0xff] }
   0x5   :  { %1041 = vmatprep.subr.bf16.mxu0 %v1061_v0  ;;  %1051 = vmatprep.subr.bf16.mxu1 %v1061_v0  ;;  %v15_v16 = vld [vmem:[%s1740_s0 + $0x8] sm:$0xff]  ;;  %v16_v18 = vld [vmem:[%s1740_s0 + $0x10] sm:$0xff]  ;;  %v17_v20 = vld [vmem:[%s1740_s0 + $0x18] sm:$0xff] }
   0x6   :  { %v46_v21 = vld [vmem:[%s1740_s0 + $0x100] sm:$0xff]  ;;  %v47_v23 = vld [vmem:[%s1740_s0 + $0x108] sm:$0xff]  ;;  %v48_v25 = vld [vmem:[%s1740_s0 + $0x110] sm:$0xff] }
   0x7   :  { %v18_v22 = vld [vmem:[%s1740_s0 + $0x20] sm:$0xff]  ;;  %v19_v24 = vld [vmem:[%s1740_s0 + $0x28] sm:$0xff]  ;;  %v20_v26 = vld [vmem:[%s1740_s0 + $0x30] sm:$0xff] }
   0x8   :  { %1043 = vmatpush3.bf16.msra.mxu0 %v1042_v7  ;;  %1055 = vmatpush3.bf16.msra.mxu1 %v1042_v7  ;;  %v49_v27 = vld [vmem:[%s1740_s0 + $0x118] sm:$0xff]  ;;  %v50_v29 = vld [vmem:[%s1740_s0 + $0x120] sm:$0xff]  ;;  %v51_v31 = vld [vmem:[%s1740_s0 + $0x128] sm:$0xff] }
   0x9   :  { %1044 = vmatprep.subr.bf16.mxu0 %v1061_v0  ;;  %1052 = vmatprep.subr.bf16.mxu1 %v1061_v0  ;;  %v21_v28 = vld [vmem:[%s1740_s0 + $0x38] sm:$0xff]  ;;  %v22_v30 = vld [vmem:[%s1740_s0 + $0x40] sm:$0xff]  ;;  %v23_v32 = vld [vmem:[%s1740_s0 + $0x48] sm:$0xff] }
   0xa   :  { %v52_v33 = vld [vmem:[%s1740_s0 + $0x130] sm:$0xff]  ;;  %v53_v35 = vld [vmem:[%s1740_s0 + $0x138] sm:$0xff]  ;;  %v54_v37 = vld [vmem:[%s1740_s0 + $0x140] sm:$0xff] }
   0xb   :  { %v24_v34 = vld [vmem:[%s1740_s0 + $0x50] sm:$0xff]  ;;  %v25_v36 = vld [vmem:[%s1740_s0 + $0x58] sm:$0xff]  ;;  %v26_v38 = vld [vmem:[%s1740_s0 + $0x60] sm:$0xff] }
   0xc   :  { %1046 = vmatpush3.bf16.msra.mxu0 %v1045_v10  ;;  %1056 = vmatpush3.bf16.msra.mxu1 %v1045_v10  ;;  %v55_v39 = vld [vmem:[%s1740_s0 + $0x148] sm:$0xff]  ;;  %v56_v41 = vld [vmem:[%s1740_s0 + $0x150] sm:$0xff]  ;;  %v57_v43 = vld [vmem:[%s1740_s0 + $0x158] sm:$0xff] }
   0xd   :  { %1047 = vmatprep.subr.bf16.mxu0 %v1061_v0  ;;  %1053 = vmatprep.subr.bf16.mxu1 %v1061_v0  ;;  %v27_v40 = vld [vmem:[%s1740_s0 + $0x68] sm:$0xff]  ;;  %v28_v42 = vld [vmem:[%s1740_s0 + $0x70] sm:$0xff]  ;;  %v29_v44 = vld [vmem:[%s1740_s0 + $0x78] sm:$0xff] }
   0xe   :  { %v58_v45 = vld [vmem:[%s1740_s0 + $0x160] sm:$0xff]  ;;  %v59_v47 = vld [vmem:[%s1740_s0 + $0x168] sm:$0xff]  ;;  %v60_v49 = vld [vmem:[%s1740_s0 + $0x170] sm:$0xff] }
   0xf   :  { %v30_v46 = vld [vmem:[%s1740_s0 + $0x80] sm:$0xff]  ;;  %v31_v48 = vld [vmem:[%s1740_s0 + $0x88] sm:$0xff]  ;;  %v32_v50 = vld [vmem:[%s1740_s0 + $0x90] sm:$0xff] }
  0x10   :  { %1049 = vmatpush3.bf16.msra.mxu0 %v1048_v13  ;;  %1057 = vmatpush3.bf16.msra.mxu1 %v1048_v13  ;;  %v61_v51 = vld [vmem:[%s1740_s0 + $0x178] sm:$0xff]  ;;  %v62_v53 = vld [vmem:[%s1740_s0 + $0x180] sm:$0xff]  ;;  %v63_v55 = vld [vmem:[%s1740_s0 + $0x188] sm:$0xff] }
  0x11   :  { %v33_v52 = vld [vmem:[%s1740_s0 + $0x98] sm:$0xff]  ;;  %v34_v54 = vld [vmem:[%s1740_s0 + $0xa0] sm:$0xff]  ;;  %v35_v56 = vld [vmem:[%s1740_s0 + $0xa8] sm:$0xff] }
  0x12   :  { %v64_v57 = vld [vmem:[%s1740_s0 + $0x190] sm:$0xff]  ;;  %v65_v59 = vld [vmem:[%s1740_s0 + $0x198] sm:$0xff]  ;;  %v66_v61 = vld [vmem:[%s1740_s0 + $0x1a0] sm:$0xff] }
  0x13   :  { %868 = vmatmul.mubr.msk.f32.vlgmr.msra.gmra.mrb[0].mxu0 %vm86_vm1, %v14_v14  ;;  %955 = vmatmul.mubr.msk.f32.vlgmr.msra.gmra.mrb[0].mxu1 %vm86_vm1, %v43_v15  ;;  %v36_v58 = vld [vmem:[%s1740_s0 + $0xb0] sm:$0xff]  ;;  %v37_v60 = vld [vmem:[%s1740_s0 + $0xb8] sm:$0xff]  ;;  %v38_v62 = vld [vmem:[%s1740_s0 + $0xc0] sm:$0xff] }
  0x14   :  { %870 = vmatprep.mubr.msk.f32.mxu0 %vm1062_vm0, %v1063_v6  ;;  %957 = vmatprep.mubr.msk.f32.mxu1 %vm1062_vm0, %v1063_v6  ;;  %v67_v63 = vld [vmem:[%s1740_s0 + $0x1a8] sm:$0xff]  ;;  %v68_v1 = vld [vmem:[%s1740_s0 + $0x1b0] sm:$0xff]  ;;  %v69_v3 = vld [vmem:[%s1740_s0 + $0x1b8] sm:$0xff] }
  0x15   :  { %v39_v0 = vld [vmem:[%s1740_s0 + $0xc8] sm:$0xff]  ;;  %v40_v2 = vld [vmem:[%s1740_s0 + $0xd0] sm:$0xff]  ;;  %v41_v4 = vld [vmem:[%s1740_s0 + $0xd8] sm:$0xff] }
  0x16   :  { %v70_v5 = vld [vmem:[%s1740_s0 + $0x1c0] sm:$0x3] }
  0x17   :  { %871 = vmatmul.mubr.msk.f32.gmra.mrb[2].mxu0 %vm86_vm1, %v15_v16  ;;  %958 = vmatmul.mubr.msk.f32.gmra.mrb[2].mxu1 %vm86_vm1, %v44_v17  ;;  %v42_v7 = vld [vmem:[%s1740_s0 + $0xe0] sm:$0xff] }
  0x18   :  { %873 = vmatprep.mubr.msk.f32.mxu0 %vm1062_vm0, %v1063_v6  ;;  %960 = vmatprep.mubr.msk.f32.mxu1 %vm1062_vm0, %v1063_v6  ;;  %v1453_v8 = vld [vmem:[%s1741_s2] ss:$0 sm:$0xff] }
  0x1b   :  { %874 = vmatmul.mubr.msk.f32.gmra.mrb[4].mxu0 %vm86_vm1, %v16_v18  ;;  %961 = vmatmul.mubr.msk.f32.gmra.mrb[4].mxu1 %vm86_vm1, %v45_v19 }
  0x1c   :  { %876 = vmatprep.mubr.msk.f32.mxu0 %vm1062_vm0, %v1063_v6  ;;  %963 = vmatprep.mubr.msk.f32.mxu1 %vm1062_vm0, %v1063_v6 }
  0x1f   :  { %877 = vmatmul.mubr.msk.f32.gmra.mrb[6].mxu0 %vm86_vm1, %v17_v20  ;;  %964 = vmatmul.mubr.msk.f32.gmra.mrb[6].mxu1 %vm86_vm1, %v46_v21 }
  0x20   :  { %879 = vmatprep.mubr.msk.f32.mxu0 %vm1062_vm0, %v1063_v6  ;;  %966 = vmatprep.mubr.msk.f32.mxu1 %vm1062_vm0, %v1063_v6 }
  0x23   :  { %880 = vmatmul.mubr.msk.f32.gmra.mrb[8].mxu0 %vm86_vm1, %v18_v22  ;;  %967 = vmatmul.mubr.msk.f32.gmra.mrb[8].mxu1 %vm86_vm1, %v47_v23 }
  0x24   :  { %882 = vmatprep.mubr.msk.f32.mxu0 %vm1062_vm0, %v1063_v6  ;;  %969 = vmatprep.mubr.msk.f32.mxu1 %vm1062_vm0, %v1063_v6 }
  0x27   :  { %883 = vmatmul.mubr.msk.f32.gmra.mrb[10].mxu0 %vm86_vm1, %v19_v24  ;;  %970 = vmatmul.mubr.msk.f32.gmra.mrb[10].mxu1 %vm86_vm1, %v48_v25 }
  0x28   :  { %885 = vmatprep.mubr.msk.f32.mxu0 %vm1062_vm0, %v1063_v6  ;;  %972 = vmatprep.mubr.msk.f32.mxu1 %vm1062_vm0, %v1063_v6 }
  0x2b   :  { %886 = vmatmul.mubr.msk.f32.gmra.mrb[12].mxu0 %vm86_vm1, %v20_v26  ;;  %973 = vmatmul.mubr.msk.f32.gmra.mrb[12].mxu1 %vm86_vm1, %v49_v27 }
  0x2c   :  { %888 = vmatprep.mubr.msk.f32.mxu0 %vm1062_vm0, %v1063_v6  ;;  %975 = vmatprep.mubr.msk.f32.mxu1 %vm1062_vm0, %v1063_v6 }
  0x2f   :  { %889 = vmatmul.mubr.msk.f32.gmra.mrb[14].mxu0 %vm86_vm1, %v21_v28  ;;  %976 = vmatmul.mubr.msk.f32.gmra.mrb[14].mxu1 %vm86_vm1, %v50_v29 }
  0x30   :  { %891 = vmatprep.mubr.msk.f32.mxu0 %vm1062_vm0, %v1063_v6  ;;  %978 = vmatprep.mubr.msk.f32.mxu1 %vm1062_vm0, %v1063_v6 }
  0x33   :  { %892 = vmatmul.mubr.msk.f32.gmra.mrb[16].mxu0 %vm86_vm1, %v22_v30  ;;  %979 = vmatmul.mubr.msk.f32.gmra.mrb[16].mxu1 %vm86_vm1, %v51_v31 }
  0x34   :  { %894 = vmatprep.mubr.msk.f32.mxu0 %vm1062_vm0, %v1063_v6  ;;  %981 = vmatprep.mubr.msk.f32.mxu1 %vm1062_vm0, %v1063_v6 }
  0x37   :  { %895 = vmatmul.mubr.msk.f32.gmra.mrb[18].mxu0 %vm86_vm1, %v23_v32  ;;  %982 = vmatmul.mubr.msk.f32.gmra.mrb[18].mxu1 %vm86_vm1, %v52_v33 }
  0x38   :  { %897 = vmatprep.mubr.msk.f32.mxu0 %vm1062_vm0, %v1063_v6  ;;  %984 = vmatprep.mubr.msk.f32.mxu1 %vm1062_vm0, %v1063_v6 }
  0x3b   :  { %898 = vmatmul.mubr.msk.f32.gmra.mrb[20].mxu0 %vm86_vm1, %v24_v34  ;;  %985 = vmatmul.mubr.msk.f32.gmra.mrb[20].mxu1 %vm86_vm1, %v53_v35 }
  0x3c   :  { %900 = vmatprep.mubr.msk.f32.mxu0 %vm1062_vm0, %v1063_v6  ;;  %987 = vmatprep.mubr.msk.f32.mxu1 %vm1062_vm0, %v1063_v6 }
  0x3f   :  { %901 = vmatmul.mubr.msk.f32.gmra.mrb[22].mxu0 %vm86_vm1, %v25_v36  ;;  %988 = vmatmul.mubr.msk.f32.gmra.mrb[22].mxu1 %vm86_vm1, %v54_v37 }
  0x40   :  { %903 = vmatprep.mubr.msk.f32.mxu0 %vm1062_vm0, %v1063_v6  ;;  %990 = vmatprep.mubr.msk.f32.mxu1 %vm1062_vm0, %v1063_v6 }
  0x43   :  { %904 = vmatmul.mubr.msk.f32.gmra.mrb[24].mxu0 %vm86_vm1, %v26_v38  ;;  %991 = vmatmul.mubr.msk.f32.gmra.mrb[24].mxu1 %vm86_vm1, %v55_v39 }
  0x44   :  { %906 = vmatprep.mubr.msk.f32.mxu0 %vm1062_vm0, %v1063_v6  ;;  %993 = vmatprep.mubr.msk.f32.mxu1 %vm1062_vm0, %v1063_v6 }
  0x47   :  { %907 = vmatmul.mubr.msk.f32.gmra.mrb[26].mxu0 %vm86_vm1, %v27_v40  ;;  %994 = vmatmul.mubr.msk.f32.gmra.mrb[26].mxu1 %vm86_vm1, %v56_v41 }
  0x48   :  { %909 = vmatprep.mubr.msk.f32.mxu0 %vm1062_vm0, %v1063_v6  ;;  %996 = vmatprep.mubr.msk.f32.mxu1 %vm1062_vm0, %v1063_v6 }
  0x4b   :  { %910 = vmatmul.mubr.msk.f32.gmra.mrb[28].mxu0 %vm86_vm1, %v28_v42  ;;  %997 = vmatmul.mubr.msk.f32.gmra.mrb[28].mxu1 %vm86_vm1, %v57_v43 }
  0x4c   :  { %912 = vmatprep.mubr.msk.f32.mxu0 %vm1062_vm0, %v1063_v6  ;;  %999 = vmatprep.mubr.msk.f32.mxu1 %vm1062_vm0, %v1063_v6 }
  0x4f   :  { %913 = vmatmul.mubr.msk.f32.gmra.mrb[30].mxu0 %vm86_vm1, %v29_v44  ;;  %1000 = vmatmul.mubr.msk.f32.gmra.mrb[30].mxu1 %vm86_vm1, %v58_v45 }
  0x50   :  { %915 = vmatprep.mubr.msk.f32.mxu0 %vm1062_vm0, %v1063_v6  ;;  %1002 = vmatprep.mubr.msk.f32.mxu1 %vm1062_vm0, %v1063_v6 }
  0x53   :  { %916 = vmatmul.mubr.msk.f32.gmra.mrb[32].mxu0 %vm86_vm1, %v30_v46  ;;  %1003 = vmatmul.mubr.msk.f32.gmra.mrb[32].mxu1 %vm86_vm1, %v59_v47 }
  0x54   :  { %918 = vmatprep.mubr.msk.f32.mxu0 %vm1062_vm0, %v1063_v6  ;;  %1005 = vmatprep.mubr.msk.f32.mxu1 %vm1062_vm0, %v1063_v6 }
  0x57   :  { %919 = vmatmul.mubr.msk.f32.gmra.mrb[34].mxu0 %vm86_vm1, %v31_v48  ;;  %1006 = vmatmul.mubr.msk.f32.gmra.mrb[34].mxu1 %vm86_vm1, %v60_v49 }
  0x58   :  { %921 = vmatprep.mubr.msk.f32.mxu0 %vm1062_vm0, %v1063_v6  ;;  %1008 = vmatprep.mubr.msk.f32.mxu1 %vm1062_vm0, %v1063_v6 }
  0x5b   :  { %922 = vmatmul.mubr.msk.f32.gmra.mrb[36].mxu0 %vm86_vm1, %v32_v50  ;;  %1009 = vmatmul.mubr.msk.f32.gmra.mrb[36].mxu1 %vm86_vm1, %v61_v51 }
  0x5c   :  { %924 = vmatprep.mubr.msk.f32.mxu0 %vm1062_vm0, %v1063_v6  ;;  %1011 = vmatprep.mubr.msk.f32.mxu1 %vm1062_vm0, %v1063_v6 }
  0x5f   :  { %925 = vmatmul.mubr.msk.f32.gmra.mrb[38].mxu0 %vm86_vm1, %v33_v52  ;;  %1012 = vmatmul.mubr.msk.f32.gmra.mrb[38].mxu1 %vm86_vm1, %v62_v53 }
  0x60   :  { %927 = vmatprep.mubr.msk.f32.mxu0 %vm1062_vm0, %v1063_v6  ;;  %1014 = vmatprep.mubr.msk.f32.mxu1 %vm1062_vm0, %v1063_v6 }
  0x63   :  { %928 = vmatmul.mubr.msk.f32.gmra.mrb[40].mxu0 %vm86_vm1, %v34_v54  ;;  %1015 = vmatmul.mubr.msk.f32.gmra.mrb[40].mxu1 %vm86_vm1, %v63_v55 }
  0x64   :  { %930 = vmatprep.mubr.msk.f32.mxu0 %vm1062_vm0, %v1063_v6  ;;  %1017 = vmatprep.mubr.msk.f32.mxu1 %vm1062_vm0, %v1063_v6 }
  0x67   :  { %931 = vmatmul.mubr.msk.f32.gmra.mrb[42].mxu0 %vm86_vm1, %v35_v56  ;;  %1018 = vmatmul.mubr.msk.f32.gmra.mrb[42].mxu1 %vm86_vm1, %v64_v57 }
  0x68   :  { %933 = vmatprep.mubr.msk.f32.mxu0 %vm1062_vm0, %v1063_v6  ;;  %1020 = vmatprep.mubr.msk.f32.mxu1 %vm1062_vm0, %v1063_v6 }
  0x6b   :  { %934 = vmatmul.mubr.msk.f32.gmra.mrb[44].mxu0 %vm86_vm1, %v36_v58  ;;  %1021 = vmatmul.mubr.msk.f32.gmra.mrb[44].mxu1 %vm86_vm1, %v65_v59 }
  0x6c   :  { %936 = vmatprep.mubr.msk.f32.mxu0 %vm1062_vm0, %v1063_v6  ;;  %1023 = vmatprep.mubr.msk.f32.mxu1 %vm1062_vm0, %v1063_v6 }
  0x6f   :  { %937 = vmatmul.mubr.msk.f32.gmra.mrb[46].mxu0 %vm86_vm1, %v37_v60  ;;  %1024 = vmatmul.mubr.msk.f32.gmra.mrb[46].mxu1 %vm86_vm1, %v66_v61 }
  0x70   :  { %939 = vmatprep.mubr.msk.f32.mxu0 %vm1062_vm0, %v1063_v6  ;;  %1026 = vmatprep.mubr.msk.f32.mxu1 %vm1062_vm0, %v1063_v6 }
  0x73   :  { %940 = vmatmul.mubr.msk.f32.gmra.mrb[48].mxu0 %vm86_vm1, %v38_v62  ;;  %1027 = vmatmul.mubr.msk.f32.gmra.mrb[48].mxu1 %vm86_vm1, %v67_v63 }
  0x74   :  { %942 = vmatprep.mubr.msk.f32.mxu0 %vm1062_vm0, %v1063_v6  ;;  %1029 = vmatprep.mubr.msk.f32.mxu1 %vm1062_vm0, %v1063_v6 }
  0x77   :  { %943 = vmatmul.mubr.msk.f32.gmra.mrb[50].mxu0 %vm86_vm1, %v39_v0  ;;  %1030 = vmatmul.mubr.msk.f32.gmra.mrb[50].mxu1 %vm86_vm1, %v68_v1 }
  0x78   :  { %945 = vmatprep.mubr.msk.f32.mxu0 %vm1062_vm0, %v1063_v6  ;;  %1032 = vmatprep.mubr.msk.f32.mxu1 %vm1062_vm0, %v1063_v6 }
  0x7b   :  { %946 = vmatmul.mubr.msk.f32.gmra.mrb[52].mxu0 %vm86_vm1, %v40_v2  ;;  %1033 = vmatmul.mubr.msk.f32.gmra.mrb[52].mxu1 %vm86_vm1, %v69_v3 }
  0x7c   :  { %948 = vmatprep.mubr.msk.f32.mxu0 %vm1062_vm0, %v1063_v6  ;;  %1035 = vmatprep.mubr.msk.f32.mxu1 %vm1062_vm0, %v1063_v6 }
  0x7f   :  { %949 = vmatmul.mubr.msk.f32.gmra.mrb[54].mxu0 %vm86_vm1, %v41_v4  ;;  %1036 = vmatmul.mubr.msk.f32.gmra.mrb[54].mxu1 %vm86_vm1, %v70_v5 }
  0x80   :  { %951 = vmatprep.mubr.msk.f32.mxu0 %vm1062_vm0, %v1063_v6 }
  0x83   :  { %952 = vmatmul.mubr.msk.f32.gmra.mrb[56].mxu0 %vm86_vm1, %v42_v7 }
  0xe6   :  { %v324_v9 = vpop.f32.mrb[0].mxu0  ;;  %v469_v10 = vpop.f32.mrb[0].mxu1 }
  0xe7   :  { %v325_v11 = vadd.f32 %v1453_v8, %v324_v9  ;;  %v869_v12 = vpop.f32.mrb[1].mxu0  ;;  %v470_v13 = vadd.f32 %v1453_v8, %v469_v10  ;;  %v956_v14 = vpop.f32.mrb[1].mxu1 }
  0xe9   :  { %v608_v6 = vmax.f32 %v325_v11, 0.0  ;;  %v637_v15 = vmax.f32 %v470_v13, 0.0 }
  0xea   :  { %v329_v16 = vpop.f32.mrb[2].mxu0  ;;  %v474_v17 = vpop.f32.mrb[2].mxu1 }
  0xeb   :  { %666 = vst.msk [vmem:[%s1742_s3] sm:$0xff] %vm665_vm2, %v608_v6  ;;  %695 = vst.msk [vmem:[%s1742_s3 + $0xe8] sm:$0xff] %vm665_vm2, %v637_v15  ;;  %v330_v18 = vadd.f32 %v1453_v8, %v329_v16  ;;  %v872_v19 = vpop.f32.mrb[3].mxu0  ;;  %v475_v20 = vadd.f32 %v1453_v8, %v474_v17  ;;  %v959_v21 = vpop.f32.mrb[3].mxu1 }
  0xed   :  { %v609_v22 = vmax.f32 %v330_v18, 0.0  ;;  %v638_v23 = vmax.f32 %v475_v20, 0.0 }
  0xee   :  { %v334_v24 = vpop.f32.mrb[4].mxu0  ;;  %v479_v25 = vpop.f32.mrb[4].mxu1 }
  0xef   :  { %667 = vst.msk [vmem:[%s1742_s3 + $0x8] sm:$0xff] %vm665_vm2, %v609_v22  ;;  %696 = vst.msk [vmem:[%s1742_s3 + $0xf0] sm:$0xff] %vm665_vm2, %v638_v23  ;;  %v335_v26 = vadd.f32 %v1453_v8, %v334_v24  ;;  %v875_v27 = vpop.f32.mrb[5].mxu0  ;;  %v480_v28 = vadd.f32 %v1453_v8, %v479_v25  ;;  %v962_v29 = vpop.f32.mrb[5].mxu1 }
  0xf1   :  { %v610_v30 = vmax.f32 %v335_v26, 0.0  ;;  %v639_v31 = vmax.f32 %v480_v28, 0.0 }
  0xf2   :  { %v339_v32 = vpop.f32.mrb[6].mxu0  ;;  %v484_v33 = vpop.f32.mrb[6].mxu1 }
  0xf3   :  { %668 = vst.msk [vmem:[%s1742_s3 + $0x10] sm:$0xff] %vm665_vm2, %v610_v30  ;;  %697 = vst.msk [vmem:[%s1742_s3 + $0xf8] sm:$0xff] %vm665_vm2, %v639_v31  ;;  %v340_v34 = vadd.f32 %v1453_v8, %v339_v32  ;;  %v878_v35 = vpop.f32.mrb[7].mxu0  ;;  %v485_v36 = vadd.f32 %v1453_v8, %v484_v33  ;;  %v965_v37 = vpop.f32.mrb[7].mxu1 }
  0xf5   :  { %v611_v38 = vmax.f32 %v340_v34, 0.0  ;;  %v640_v39 = vmax.f32 %v485_v36, 0.0 }
  0xf6   :  { %v344_v40 = vpop.f32.mrb[8].mxu0  ;;  %v489_v41 = vpop.f32.mrb[8].mxu1 }
  0xf7   :  { %669 = vst.msk [vmem:[%s1742_s3 + $0x18] sm:$0xff] %vm665_vm2, %v611_v38  ;;  %698 = vst.msk [vmem:[%s1742_s3 + $0x100] sm:$0xff] %vm665_vm2, %v640_v39  ;;  %v345_v42 = vadd.f32 %v1453_v8, %v344_v40  ;;  %v881_v43 = vpop.f32.mrb[9].mxu0  ;;  %v490_v44 = vadd.f32 %v1453_v8, %v489_v41  ;;  %v968_v45 = vpop.f32.mrb[9].mxu1 }
  0xf9   :  { %v612_v46 = vmax.f32 %v345_v42, 0.0  ;;  %v641_v47 = vmax.f32 %v490_v44, 0.0 }
  0xfa   :  { %v349_v48 = vpop.f32.mrb[10].mxu0  ;;  %v494_v49 = vpop.f32.mrb[10].mxu1 }
  0xfb   :  { %670 = vst.msk [vmem:[%s1742_s3 + $0x20] sm:$0xff] %vm665_vm2, %v612_v46  ;;  %699 = vst.msk [vmem:[%s1742_s3 + $0x108] sm:$0xff] %vm665_vm2, %v641_v47  ;;  %v350_v50 = vadd.f32 %v1453_v8, %v349_v48  ;;  %v884_v51 = vpop.f32.mrb[11].mxu0  ;;  %v495_v52 = vadd.f32 %v1453_v8, %v494_v49  ;;  %v971_v53 = vpop.f32.mrb[11].mxu1 }
  0xfd   :  { %v613_v54 = vmax.f32 %v350_v50, 0.0  ;;  %v642_v55 = vmax.f32 %v495_v52, 0.0 }
  0xfe   :  { %v354_v56 = vpop.f32.mrb[12].mxu0  ;;  %v499_v57 = vpop.f32.mrb[12].mxu1 }
  0xff   :  { %671 = vst.msk [vmem:[%s1742_s3 + $0x28] sm:$0xff] %vm665_vm2, %v613_v54  ;;  %700 = vst.msk [vmem:[%s1742_s3 + $0x110] sm:$0xff] %vm665_vm2, %v642_v55  ;;  %v355_v58 = vadd.f32 %v1453_v8, %v354_v56  ;;  %v887_v59 = vpop.f32.mrb[13].mxu0  ;;  %v500_v60 = vadd.f32 %v1453_v8, %v499_v57  ;;  %v974_v61 = vpop.f32.mrb[13].mxu1 }
 0x101   :  { %v614_v62 = vmax.f32 %v355_v58, 0.0  ;;  %v643_v63 = vmax.f32 %v500_v60, 0.0 }
 0x102   :  { %v359_v0 = vpop.f32.mrb[14].mxu0  ;;  %v504_v1 = vpop.f32.mrb[14].mxu1 }
 0x103   :  { %672 = vst.msk [vmem:[%s1742_s3 + $0x30] sm:$0xff] %vm665_vm2, %v614_v62  ;;  %701 = vst.msk [vmem:[%s1742_s3 + $0x118] sm:$0xff] %vm665_vm2, %v643_v63  ;;  %v360_v2 = vadd.f32 %v1453_v8, %v359_v0  ;;  %v890_v3 = vpop.f32.mrb[15].mxu0  ;;  %v505_v4 = vadd.f32 %v1453_v8, %v504_v1  ;;  %v977_v5 = vpop.f32.mrb[15].mxu1 }
 0x105   :  { %v615_v7 = vmax.f32 %v360_v2, 0.0  ;;  %v644_v9 = vmax.f32 %v505_v4, 0.0 }
 0x106   :  { %v364_v10 = vpop.f32.mrb[16].mxu0  ;;  %v509_v11 = vpop.f32.mrb[16].mxu1 }
 0x107   :  { %673 = vst.msk [vmem:[%s1742_s3 + $0x38] sm:$0xff] %vm665_vm2, %v615_v7  ;;  %702 = vst.msk [vmem:[%s1742_s3 + $0x120] sm:$0xff] %vm665_vm2, %v644_v9  ;;  %v365_v12 = vadd.f32 %v1453_v8, %v364_v10  ;;  %v893_v13 = vpop.f32.mrb[17].mxu0  ;;  %v510_v14 = vadd.f32 %v1453_v8, %v509_v11  ;;  %v980_v6 = vpop.f32.mrb[17].mxu1 }
 0x109   :  { %v616_v15 = vmax.f32 %v365_v12, 0.0  ;;  %v645_v16 = vmax.f32 %v510_v14, 0.0 }
 0x10a   :  { %v369_v17 = vpop.f32.mrb[18].mxu0  ;;  %v514_v18 = vpop.f32.mrb[18].mxu1 }
 0x10b   :  { %674 = vst.msk [vmem:[%s1742_s3 + $0x40] sm:$0xff] %vm665_vm2, %v616_v15  ;;  %703 = vst.msk [vmem:[%s1742_s3 + $0x128] sm:$0xff] %vm665_vm2, %v645_v16  ;;  %v370_v19 = vadd.f32 %v1453_v8, %v369_v17  ;;  %v896_v20 = vpop.f32.mrb[19].mxu0  ;;  %v515_v21 = vadd.f32 %v1453_v8, %v514_v18  ;;  %v983_v22 = vpop.f32.mrb[19].mxu1 }
 0x10d   :  { %v617_v23 = vmax.f32 %v370_v19, 0.0  ;;  %v646_v24 = vmax.f32 %v515_v21, 0.0 }
 0x10e   :  { %v374_v25 = vpop.f32.mrb[20].mxu0  ;;  %v519_v26 = vpop.f32.mrb[20].mxu1 }
 0x10f   :  { %675 = vst.msk [vmem:[%s1742_s3 + $0x48] sm:$0xff] %vm665_vm2, %v617_v23  ;;  %704 = vst.msk [vmem:[%s1742_s3 + $0x130] sm:$0xff] %vm665_vm2, %v646_v24  ;;  %v375_v27 = vadd.f32 %v1453_v8, %v374_v25  ;;  %v899_v28 = vpop.f32.mrb[21].mxu0  ;;  %v520_v29 = vadd.f32 %v1453_v8, %v519_v26  ;;  %v986_v30 = vpop.f32.mrb[21].mxu1 }
 0x111   :  { %v618_v31 = vmax.f32 %v375_v27, 0.0  ;;  %v647_v32 = vmax.f32 %v520_v29, 0.0 }
 0x112   :  { %v379_v33 = vpop.f32.mrb[22].mxu0  ;;  %v524_v34 = vpop.f32.mrb[22].mxu1 }
 0x113   :  { %676 = vst.msk [vmem:[%s1742_s3 + $0x50] sm:$0xff] %vm665_vm2, %v618_v31  ;;  %705 = vst.msk [vmem:[%s1742_s3 + $0x138] sm:$0xff] %vm665_vm2, %v647_v32  ;;  %v380_v35 = vadd.f32 %v1453_v8, %v379_v33  ;;  %v902_v36 = vpop.f32.mrb[23].mxu0  ;;  %v525_v37 = vadd.f32 %v1453_v8, %v524_v34  ;;  %v989_v38 = vpop.f32.mrb[23].mxu1 }
 0x115   :  { %v619_v39 = vmax.f32 %v380_v35, 0.0  ;;  %v648_v40 = vmax.f32 %v525_v37, 0.0 }
 0x116   :  { %v384_v41 = vpop.f32.mrb[24].mxu0  ;;  %v529_v42 = vpop.f32.mrb[24].mxu1 }
 0x117   :  { %677 = vst.msk [vmem:[%s1742_s3 + $0x58] sm:$0xff] %vm665_vm2, %v619_v39  ;;  %706 = vst.msk [vmem:[%s1742_s3 + $0x140] sm:$0xff] %vm665_vm2, %v648_v40  ;;  %v385_v43 = vadd.f32 %v1453_v8, %v384_v41  ;;  %v905_v44 = vpop.f32.mrb[25].mxu0  ;;  %v530_v45 = vadd.f32 %v1453_v8, %v529_v42  ;;  %v992_v46 = vpop.f32.mrb[25].mxu1 }
 0x119   :  { %v620_v47 = vmax.f32 %v385_v43, 0.0  ;;  %v649_v48 = vmax.f32 %v530_v45, 0.0 }
 0x11a   :  { %v389_v49 = vpop.f32.mrb[26].mxu0  ;;  %v534_v50 = vpop.f32.mrb[26].mxu1 }
 0x11b   :  { %678 = vst.msk [vmem:[%s1742_s3 + $0x60] sm:$0xff] %vm665_vm2, %v620_v47  ;;  %707 = vst.msk [vmem:[%s1742_s3 + $0x148] sm:$0xff] %vm665_vm2, %v649_v48  ;;  %v390_v51 = vadd.f32 %v1453_v8, %v389_v49  ;;  %v908_v52 = vpop.f32.mrb[27].mxu0  ;;  %v535_v53 = vadd.f32 %v1453_v8, %v534_v50  ;;  %v995_v54 = vpop.f32.mrb[27].mxu1 }
 0x11d   :  { %v621_v55 = vmax.f32 %v390_v51, 0.0  ;;  %v650_v56 = vmax.f32 %v535_v53, 0.0 }
 0x11e   :  { %v394_v57 = vpop.f32.mrb[28].mxu0  ;;  %v539_v58 = vpop.f32.mrb[28].mxu1 }
 0x11f   :  { %679 = vst.msk [vmem:[%s1742_s3 + $0x68] sm:$0xff] %vm665_vm2, %v621_v55  ;;  %708 = vst.msk [vmem:[%s1742_s3 + $0x150] sm:$0xff] %vm665_vm2, %v650_v56  ;;  %v395_v59 = vadd.f32 %v1453_v8, %v394_v57  ;;  %v911_v60 = vpop.f32.mrb[29].mxu0  ;;  %v540_v61 = vadd.f32 %v1453_v8, %v539_v58  ;;  %v998_v62 = vpop.f32.mrb[29].mxu1 }
 0x121   :  { %v622_v63 = vmax.f32 %v395_v59, 0.0  ;;  %v651_v0 = vmax.f32 %v540_v61, 0.0 }
 0x122   :  { %v399_v1 = vpop.f32.mrb[30].mxu0  ;;  %v544_v2 = vpop.f32.mrb[30].mxu1 }
 0x123   :  { %680 = vst.msk [vmem:[%s1742_s3 + $0x70] sm:$0xff] %vm665_vm2, %v622_v63  ;;  %709 = vst.msk [vmem:[%s1742_s3 + $0x158] sm:$0xff] %vm665_vm2, %v651_v0  ;;  %v400_v3 = vadd.f32 %v1453_v8, %v399_v1  ;;  %v914_v4 = vpop.f32.mrb[31].mxu0  ;;  %v545_v5 = vadd.f32 %v1453_v8, %v544_v2  ;;  %v1001_v7 = vpop.f32.mrb[31].mxu1 }
 0x125   :  { %v623_v9 = vmax.f32 %v400_v3, 0.0  ;;  %v652_v10 = vmax.f32 %v545_v5, 0.0 }
 0x126   :  { %v404_v11 = vpop.f32.mrb[32].mxu0  ;;  %v549_v12 = vpop.f32.mrb[32].mxu1 }
 0x127   :  { %681 = vst.msk [vmem:[%s1742_s3 + $0x78] sm:$0xff] %vm665_vm2, %v623_v9  ;;  %710 = vst.msk [vmem:[%s1742_s3 + $0x160] sm:$0xff] %vm665_vm2, %v652_v10  ;;  %v405_v13 = vadd.f32 %v1453_v8, %v404_v11  ;;  %v917_v14 = vpop.f32.mrb[33].mxu0  ;;  %v550_v6 = vadd.f32 %v1453_v8, %v549_v12  ;;  %v1004_v15 = vpop.f32.mrb[33].mxu1 }
 0x129   :  { %v624_v16 = vmax.f32 %v405_v13, 0.0  ;;  %v653_v17 = vmax.f32 %v550_v6, 0.0 }
 0x12a   :  { %v409_v18 = vpop.f32.mrb[34].mxu0  ;;  %v554_v19 = vpop.f32.mrb[34].mxu1 }
 0x12b   :  { %682 = vst.msk [vmem:[%s1742_s3 + $0x80] sm:$0xff] %vm665_vm2, %v624_v16  ;;  %711 = vst.msk [vmem:[%s1742_s3 + $0x168] sm:$0xff] %vm665_vm2, %v653_v17  ;;  %v410_v20 = vadd.f32 %v1453_v8, %v409_v18  ;;  %v920_v21 = vpop.f32.mrb[35].mxu0  ;;  %v555_v22 = vadd.f32 %v1453_v8, %v554_v19  ;;  %v1007_v23 = vpop.f32.mrb[35].mxu1 }
 0x12d   :  { %v625_v24 = vmax.f32 %v410_v20, 0.0  ;;  %v654_v25 = vmax.f32 %v555_v22, 0.0 }
 0x12e   :  { %v414_v26 = vpop.f32.mrb[36].mxu0  ;;  %v559_v27 = vpop.f32.mrb[36].mxu1 }
 0x12f   :  { %683 = vst.msk [vmem:[%s1742_s3 + $0x88] sm:$0xff] %vm665_vm2, %v625_v24  ;;  %712 = vst.msk [vmem:[%s1742_s3 + $0x170] sm:$0xff] %vm665_vm2, %v654_v25  ;;  %v415_v28 = vadd.f32 %v1453_v8, %v414_v26  ;;  %v923_v29 = vpop.f32.mrb[37].mxu0  ;;  %v560_v30 = vadd.f32 %v1453_v8, %v559_v27  ;;  %v1010_v31 = vpop.f32.mrb[37].mxu1 }
 0x131   :  { %v626_v32 = vmax.f32 %v415_v28, 0.0  ;;  %v655_v33 = vmax.f32 %v560_v30, 0.0 }
 0x132   :  { %v419_v34 = vpop.f32.mrb[38].mxu0  ;;  %v564_v35 = vpop.f32.mrb[38].mxu1 }
 0x133   :  { %684 = vst.msk [vmem:[%s1742_s3 + $0x90] sm:$0xff] %vm665_vm2, %v626_v32  ;;  %713 = vst.msk [vmem:[%s1742_s3 + $0x178] sm:$0xff] %vm665_vm2, %v655_v33  ;;  %v420_v36 = vadd.f32 %v1453_v8, %v419_v34  ;;  %v926_v37 = vpop.f32.mrb[39].mxu0  ;;  %v565_v38 = vadd.f32 %v1453_v8, %v564_v35  ;;  %v1013_v39 = vpop.f32.mrb[39].mxu1 }
 0x135   :  { %v627_v40 = vmax.f32 %v420_v36, 0.0  ;;  %v656_v41 = vmax.f32 %v565_v38, 0.0 }
 0x136   :  { %v424_v42 = vpop.f32.mrb[40].mxu0  ;;  %v569_v43 = vpop.f32.mrb[40].mxu1 }
 0x137   :  { %685 = vst.msk [vmem:[%s1742_s3 + $0x98] sm:$0xff] %vm665_vm2, %v627_v40  ;;  %714 = vst.msk [vmem:[%s1742_s3 + $0x180] sm:$0xff] %vm665_vm2, %v656_v41  ;;  %v425_v44 = vadd.f32 %v1453_v8, %v424_v42  ;;  %v929_v45 = vpop.f32.mrb[41].mxu0  ;;  %v570_v46 = vadd.f32 %v1453_v8, %v569_v43  ;;  %v1016_v47 = vpop.f32.mrb[41].mxu1 }
 0x139   :  { %v628_v48 = vmax.f32 %v425_v44, 0.0  ;;  %v657_v49 = vmax.f32 %v570_v46, 0.0 }
 0x13a   :  { %v429_v50 = vpop.f32.mrb[42].mxu0  ;;  %v574_v51 = vpop.f32.mrb[42].mxu1 }
 0x13b   :  { %686 = vst.msk [vmem:[%s1742_s3 + $0xa0] sm:$0xff] %vm665_vm2, %v628_v48  ;;  %715 = vst.msk [vmem:[%s1742_s3 + $0x188] sm:$0xff] %vm665_vm2, %v657_v49  ;;  %v430_v52 = vadd.f32 %v1453_v8, %v429_v50  ;;  %v932_v53 = vpop.f32.mrb[43].mxu0  ;;  %v575_v54 = vadd.f32 %v1453_v8, %v574_v51  ;;  %v1019_v55 = vpop.f32.mrb[43].mxu1 }
 0x13d   :  { %v629_v56 = vmax.f32 %v430_v52, 0.0  ;;  %v658_v57 = vmax.f32 %v575_v54, 0.0 }
 0x13e   :  { %v434_v58 = vpop.f32.mrb[44].mxu0  ;;  %v579_v59 = vpop.f32.mrb[44].mxu1 }
 0x13f   :  { %687 = vst.msk [vmem:[%s1742_s3 + $0xa8] sm:$0xff] %vm665_vm2, %v629_v56  ;;  %716 = vst.msk [vmem:[%s1742_s3 + $0x190] sm:$0xff] %vm665_vm2, %v658_v57  ;;  %v435_v60 = vadd.f32 %v1453_v8, %v434_v58  ;;  %v935_v61 = vpop.f32.mrb[45].mxu0  ;;  %v580_v62 = vadd.f32 %v1453_v8, %v579_v59  ;;  %v1022_v63 = vpop.f32.mrb[45].mxu1 }
 0x141   :  { %v630_v0 = vmax.f32 %v435_v60, 0.0  ;;  %v659_v1 = vmax.f32 %v580_v62, 0.0 }
 0x142   :  { %v439_v2 = vpop.f32.mrb[46].mxu0  ;;  %v584_v3 = vpop.f32.mrb[46].mxu1 }
 0x143   :  { %688 = vst.msk [vmem:[%s1742_s3 + $0xb0] sm:$0xff] %vm665_vm2, %v630_v0  ;;  %717 = vst.msk [vmem:[%s1742_s3 + $0x198] sm:$0xff] %vm665_vm2, %v659_v1  ;;  %v440_v4 = vadd.f32 %v1453_v8, %v439_v2  ;;  %v938_v5 = vpop.f32.mrb[47].mxu0  ;;  %v585_v7 = vadd.f32 %v1453_v8, %v584_v3  ;;  %v1025_v9 = vpop.f32.mrb[47].mxu1 }
 0x145   :  { %v631_v10 = vmax.f32 %v440_v4, 0.0  ;;  %v660_v11 = vmax.f32 %v585_v7, 0.0 }
 0x146   :  { %v444_v12 = vpop.f32.mrb[48].mxu0  ;;  %v589_v13 = vpop.f32.mrb[48].mxu1 }
 0x147   :  { %689 = vst.msk [vmem:[%s1742_s3 + $0xb8] sm:$0xff] %vm665_vm2, %v631_v10  ;;  %718 = vst.msk [vmem:[%s1742_s3 + $0x1a0] sm:$0xff] %vm665_vm2, %v660_v11  ;;  %v445_v14 = vadd.f32 %v1453_v8, %v444_v12  ;;  %v941_v6 = vpop.f32.mrb[49].mxu0  ;;  %v590_v15 = vadd.f32 %v1453_v8, %v589_v13  ;;  %v1028_v16 = vpop.f32.mrb[49].mxu1 }
 0x149   :  { %v632_v17 = vmax.f32 %v445_v14, 0.0  ;;  %v661_v18 = vmax.f32 %v590_v15, 0.0 }
 0x14a   :  { %v449_v19 = vpop.f32.mrb[50].mxu0  ;;  %v594_v20 = vpop.f32.mrb[50].mxu1 }
 0x14b   :  { %690 = vst.msk [vmem:[%s1742_s3 + $0xc0] sm:$0xff] %vm665_vm2, %v632_v17  ;;  %719 = vst.msk [vmem:[%s1742_s3 + $0x1a8] sm:$0xff] %vm665_vm2, %v661_v18  ;;  %v450_v21 = vadd.f32 %v1453_v8, %v449_v19  ;;  %v944_v22 = vpop.f32.mrb[51].mxu0  ;;  %v595_v23 = vadd.f32 %v1453_v8, %v594_v20  ;;  %v1031_v24 = vpop.f32.mrb[51].mxu1 }
 0x14d   :  { %v633_v25 = vmax.f32 %v450_v21, 0.0  ;;  %v662_v26 = vmax.f32 %v595_v23, 0.0 }
 0x14e   :  { %v454_v27 = vpop.f32.mrb[52].mxu0  ;;  %v599_v28 = vpop.f32.mrb[52].mxu1 }
 0x14f   :  { %691 = vst.msk [vmem:[%s1742_s3 + $0xc8] sm:$0xff] %vm665_vm2, %v633_v25  ;;  %720 = vst.msk [vmem:[%s1742_s3 + $0x1b0] sm:$0xff] %vm665_vm2, %v662_v26  ;;  %v455_v29 = vadd.f32 %v1453_v8, %v454_v27  ;;  %v947_v30 = vpop.f32.mrb[53].mxu0  ;;  %v600_v31 = vadd.f32 %v1453_v8, %v599_v28  ;;  %v1034_v32 = vpop.f32.mrb[53].mxu1 }
 0x151   :  { %v634_v33 = vmax.f32 %v455_v29, 0.0  ;;  %v663_v34 = vmax.f32 %v600_v31, 0.0 }
 0x152   :  { %v459_v35 = vpop.f32.mrb[54].mxu0  ;;  %v604_v36 = vpop.f32.mrb[54].mxu1 }
 0x153   :  { %692 = vst.msk [vmem:[%s1742_s3 + $0xd0] sm:$0xff] %vm665_vm2, %v634_v33  ;;  %721 = vst.msk [vmem:[%s1742_s3 + $0x1b8] sm:$0xff] %vm665_vm2, %v663_v34  ;;  %v460_v37 = vadd.f32 %v1453_v8, %v459_v35  ;;  %v950_v38 = vpop.f32.mrb[55].mxu0  ;;  %v605_v39 = vadd.f32 %v1453_v8, %v604_v36  ;;  %v1037_v40 = vpop.f32.mrb[55].mxu1 }
 0x155   :  { %v635_v41 = vmax.f32 %v460_v37, 0.0  ;;  %v664_v42 = vmax.f32 %v605_v39, 0.0 }
 0x156   :  { %v464_v43 = vpop.f32.mrb[56].mxu0 }
 0x157   :  { %693 = vst.msk [vmem:[%s1742_s3 + $0xd8] sm:$0xff] %vm665_vm2, %v635_v41  ;;  %v465_v44 = vadd.f32 %v1453_v8, %v464_v43  ;;  %v953_v45 = vpop.f32.mrb[57].mxu0 }
 0x158   :  { %723 = vst.msk [vmem:[%s1742_s3 + $0x1c0] sm:$0x3] %vm722_vm3, %v664_v42 }
 0x159   :  { %v636_v46 = vmax.f32 %v465_v44, 0.0 }
 0x15b   :  { %694 = vst.msk [vmem:[%s1742_s3 + $0xe0] sm:$0xff] %vm665_vm2, %v636_v46 }

// kernel: pointnav_baseline_net_forward.5
= control target key start
LH: loop header
LB: loop body
LE: loop exit
PB: predicated region body
PF: predicated region fallthrough
CT: control target
= control target key end

     0   :  { %vm350_vm0 = vcmask 523264   ;;  %s917_s1 = inlined_call_operand.vmem [shape: f32[512,64], index: 1, kind: input, shape index: {}]   ;;  %s918_s0 = inlined_call_operand.vmem [shape: f32[72,512], index: 0, kind: input, shape index: {}]   ;;  %s919_s2 = inlined_call_operand.vmem [shape: f32[1,64], index: 2, kind: input, shape index: {}]   ;;  %s920_s3 = inlined_call_operand.vmem [shape: f32[72,64], index: 3, kind: output, shape index: {}]  }
   0x1   :  { %v66_v0 = vld [vmem:[%s917_s1 + $0x80] sm:$0xff]  ;;  %v67_v1 = vld [vmem:[%s917_s1 + $0x88] sm:$0xff]  ;;  %v68_v11 = vld [vmem:[%s917_s1 + $0x90] sm:$0xff] }
   0x2   :  { %v50_v2 = vld [vmem:[%s917_s1] sm:$0xff]  ;;  %v483_v3 = vpack.c.bf16 %v67_v1, %v66_v0  ;;  %v51_v4 = vld [vmem:[%s917_s1 + $0x8] sm:$0xff]  ;;  %v69_v13 = vld [vmem:[%s917_s1 + $0x98] sm:$0xff] }
   0x3   :  { %v98_v5 = vld [vmem:[%s917_s1 + $0x180] sm:$0xff]  ;;  %v99_v6 = vld [vmem:[%s917_s1 + $0x188] sm:$0xff]  ;;  %v485_v7 = vpack.c.bf16 %v51_v4, %v50_v2  ;;  %v52_v14 = vld [vmem:[%s917_s1 + $0x10] sm:$0xff]  ;;  %v487_v16 = vpack.c.bf16 %v69_v13, %v68_v11 }
   0x4   :  { %v515_v8 = vpack.c.bf16 %v99_v6, %v98_v5  ;;  %v82_v9 = vld [vmem:[%s917_s1 + $0x100] sm:$0xff]  ;;  %v83_v10 = vld [vmem:[%s917_s1 + $0x108] sm:$0xff]  ;;  %484 = vmatprep.subr.bf16.mxu0 %v483_v3  ;;  %v53_v15 = vld [vmem:[%s917_s1 + $0x18] sm:$0xff] }
   0x5   :  { %v517_v12 = vpack.c.bf16 %v83_v10, %v82_v9  ;;  %486 = vmatpush3.bf16.msra.mxu0 %v485_v7  ;;  %v489_v17 = vpack.c.bf16 %v53_v15, %v52_v14  ;;  %v100_v18 = vld [vmem:[%s917_s1 + $0x190] sm:$0xff]  ;;  %v101_v19 = vld [vmem:[%s917_s1 + $0x198] sm:$0xff]  ;;  %v70_v23 = vld [vmem:[%s917_s1 + $0xa0] sm:$0xff] }
   0x6   :  { %516 = vmatprep.subr.bf16.mxu1 %v515_v8  ;;  %v84_v20 = vld [vmem:[%s917_s1 + $0x110] sm:$0xff]  ;;  %v519_v21 = vpack.c.bf16 %v101_v19, %v100_v18  ;;  %v85_v22 = vld [vmem:[%s917_s1 + $0x118] sm:$0xff]  ;;  %v71_v24 = vld [vmem:[%s917_s1 + $0xa8] sm:$0xff]  ;;  %488 = vmatprep.subr.bf16.mxu0 %v487_v16 }
   0x7   :  { %518 = vmatpush3.bf16.msra.mxu1 %v517_v12  ;;  %v521_v25 = vpack.c.bf16 %v85_v22, %v84_v20  ;;  %v491_v26 = vpack.c.bf16 %v71_v24, %v70_v23  ;;  %v54_v27 = vld [vmem:[%s917_s1 + $0x20] sm:$0xff]  ;;  %v55_v28 = vld [vmem:[%s917_s1 + $0x28] sm:$0xff]  ;;  %v72_v35 = vld [vmem:[%s917_s1 + $0xb0] sm:$0xff] }
   0x8   :  { %v102_v29 = vld [vmem:[%s917_s1 + $0x1a0] sm:$0xff]  ;;  %520 = vmatprep.subr.bf16.mxu1 %v519_v21  ;;  %v103_v30 = vld [vmem:[%s917_s1 + $0x1a8] sm:$0xff]  ;;  %v493_v33 = vpack.c.bf16 %v55_v28, %v54_v27  ;;  %v73_v36 = vld [vmem:[%s917_s1 + $0xb8] sm:$0xff] }
   0x9   :  { %v86_v31 = vld [vmem:[%s917_s1 + $0x120] sm:$0xff]  ;;  %v87_v32 = vld [vmem:[%s917_s1 + $0x128] sm:$0xff]  ;;  %490 = vmatpush3.bf16.msra.mxu0 %v489_v17  ;;  %v523_v34 = vpack.c.bf16 %v103_v30, %v102_v29  ;;  %v56_v37 = vld [vmem:[%s917_s1 + $0x30] sm:$0xff]  ;;  %v495_v39 = vpack.c.bf16 %v73_v36, %v72_v35 }
   0xa   :  { %492 = vmatprep.subr.bf16.mxu0 %v491_v26  ;;  %v525_v38 = vpack.c.bf16 %v87_v32, %v86_v31  ;;  %v57_v40 = vld [vmem:[%s917_s1 + $0x38] sm:$0xff]  ;;  %v104_v41 = vld [vmem:[%s917_s1 + $0x1b0] sm:$0xff]  ;;  %v74_v46 = vld [vmem:[%s917_s1 + $0xc0] sm:$0xff] }
   0xb   :  { %522 = vmatpush3.bf16.msra.mxu1 %v521_v25  ;;  %v105_v42 = vld [vmem:[%s917_s1 + $0x1b8] sm:$0xff]  ;;  %v88_v44 = vld [vmem:[%s917_s1 + $0x130] sm:$0xff]  ;;  %v75_v47 = vld [vmem:[%s917_s1 + $0xc8] sm:$0xff]  ;;  %v497_v48 = vpack.c.bf16 %v57_v40, %v56_v37 }
   0xc   :  { %524 = vmatprep.subr.bf16.mxu1 %v523_v34  ;;  %v527_v43 = vpack.c.bf16 %v105_v42, %v104_v41  ;;  %v89_v45 = vld [vmem:[%s917_s1 + $0x138] sm:$0xff]  ;;  %v106_v49 = vld [vmem:[%s917_s1 + $0x1c0] sm:$0xff]  ;;  %v107_v50 = vld [vmem:[%s917_s1 + $0x1c8] sm:$0xff]  ;;  %v499_v52 = vpack.c.bf16 %v75_v47, %v74_v46 }
   0xd   :  { %494 = vmatpush3.bf16.msra.mxu0 %v493_v33  ;;  %v529_v51 = vpack.c.bf16 %v89_v45, %v88_v44  ;;  %v58_v53 = vld [vmem:[%s917_s1 + $0x40] sm:$0xff]  ;;  %v59_v54 = vld [vmem:[%s917_s1 + $0x48] sm:$0xff]  ;;  %v531_v56 = vpack.c.bf16 %v107_v50, %v106_v49  ;;  %v76_v58 = vld [vmem:[%s917_s1 + $0xd0] sm:$0xff] }
   0xe   :  { %496 = vmatprep.subr.bf16.mxu0 %v495_v39  ;;  %v90_v55 = vld [vmem:[%s917_s1 + $0x140] sm:$0xff]  ;;  %v91_v57 = vld [vmem:[%s917_s1 + $0x148] sm:$0xff]  ;;  %v77_v59 = vld [vmem:[%s917_s1 + $0xd8] sm:$0xff]  ;;  %v501_v62 = vpack.c.bf16 %v59_v54, %v58_v53 }
   0xf   :  { %526 = vmatpush3.bf16.msra.mxu1 %v525_v38  ;;  %v108_v60 = vld [vmem:[%s917_s1 + $0x1d0] sm:$0xff]  ;;  %v109_v61 = vld [vmem:[%s917_s1 + $0x1d8] sm:$0xff]  ;;  %v533_v63 = vpack.c.bf16 %v91_v57, %v90_v55  ;;  %v503_v0 = vpack.c.bf16 %v77_v59, %v76_v58  ;;  %v78_v6 = vld [vmem:[%s917_s1 + $0xe0] sm:$0xff] }
  0x10   :  { %528 = vmatprep.subr.bf16.mxu1 %v527_v43  ;;  %v60_v1 = vld [vmem:[%s917_s1 + $0x50] sm:$0xff]  ;;  %v61_v2 = vld [vmem:[%s917_s1 + $0x58] sm:$0xff]  ;;  %v535_v4 = vpack.c.bf16 %v109_v61, %v108_v60  ;;  %v79_v7 = vld [vmem:[%s917_s1 + $0xe8] sm:$0xff] }
  0x11   :  { %498 = vmatpush3.bf16.msra.mxu0 %v497_v48  ;;  %v92_v3 = vld [vmem:[%s917_s1 + $0x150] sm:$0xff]  ;;  %v93_v5 = vld [vmem:[%s917_s1 + $0x158] sm:$0xff]  ;;  %v110_v8 = vld [vmem:[%s917_s1 + $0x1e0] sm:$0xff]  ;;  %v505_v10 = vpack.c.bf16 %v61_v2, %v60_v1  ;;  %v507_v14 = vpack.c.bf16 %v79_v7, %v78_v6 }
  0x12   :  { %500 = vmatprep.subr.bf16.mxu0 %v499_v52  ;;  %v111_v9 = vld [vmem:[%s917_s1 + $0x1e8] sm:$0xff]  ;;  %v62_v11 = vld [vmem:[%s917_s1 + $0x60] sm:$0xff]  ;;  %v537_v13 = vpack.c.bf16 %v93_v5, %v92_v3  ;;  %v80_v19 = vld [vmem:[%s917_s1 + $0xf0] sm:$0xff] }
  0x13   :  { %530 = vmatpush3.bf16.msra.mxu1 %v529_v51  ;;  %v63_v12 = vld [vmem:[%s917_s1 + $0x68] sm:$0xff]  ;;  %v94_v15 = vld [vmem:[%s917_s1 + $0x160] sm:$0xff]  ;;  %v539_v18 = vpack.c.bf16 %v111_v9, %v110_v8  ;;  %v81_v20 = vld [vmem:[%s917_s1 + $0xf8] sm:$0xff] }
  0x14   :  { %532 = vmatprep.subr.bf16.mxu1 %v531_v56  ;;  %v95_v16 = vld [vmem:[%s917_s1 + $0x168] sm:$0xff]  ;;  %v17_v21 = vld [vmem:[%s918_s0 + $0x18] sm:$0xff]  ;;  %v112_v22 = vld [vmem:[%s917_s1 + $0x1f0] sm:$0xff]  ;;  %v509_v24 = vpack.c.bf16 %v63_v12, %v62_v11  ;;  %v511_v26 = vpack.c.bf16 %v81_v20, %v80_v19 }
  0x15   :  { %502 = vmatpush3.bf16.msra.mxu0 %v501_v62  ;;  %v15_v17 = vld [vmem:[%s918_s0 + $0x8] sm:$0xff]  ;;  %v113_v23 = vld [vmem:[%s917_s1 + $0x1f8] sm:$0xff]  ;;  %295 = vmatprep.mubr.f32.mxu1 %v17_v21  ;;  %v541_v25 = vpack.c.bf16 %v95_v16, %v94_v15  ;;  %v64_v27 = vld [vmem:[%s917_s1 + $0x70] sm:$0xff] }
  0x16   :  { %504 = vmatprep.subr.bf16.mxu0 %v503_v0  ;;  %185 = vmatprep.mubr.f32.mxu0 %v15_v17  ;;  %v65_v28 = vld [vmem:[%s917_s1 + $0x78] sm:$0xff]  ;;  %v543_v29 = vpack.c.bf16 %v113_v23, %v112_v22  ;;  %v96_v30 = vld [vmem:[%s917_s1 + $0x170] sm:$0xff]  ;;  %v14_v34 = vld [vmem:[%s918_s0] sm:$0xff] }
  0x17   :  { %534 = vmatpush3.bf16.msra.mxu1 %v533_v63  ;;  %v97_v31 = vld [vmem:[%s917_s1 + $0x178] sm:$0xff]  ;;  %v513_v32 = vpack.c.bf16 %v65_v28, %v64_v27  ;;  %v16_v35 = vld [vmem:[%s918_s0 + $0x10] sm:$0xff]  ;;  %v19_v36 = vld [vmem:[%s918_s0 + $0x28] sm:$0xff] }
  0x18   :  { %536 = vmatprep.subr.bf16.mxu1 %v535_v4  ;;  %v545_v33 = vpack.c.bf16 %v97_v31, %v96_v30  ;;  %v21_v37 = vld [vmem:[%s918_s0 + $0x38] sm:$0xff]  ;;  %v18_v38 = vld [vmem:[%s918_s0 + $0x20] sm:$0xff]  ;;  %v20_v39 = vld [vmem:[%s918_s0 + $0x30] sm:$0xff] }
  0x19   :  { %506 = vmatpush3.bf16.msra.mxu0 %v505_v10  ;;  %v23_v40 = vld [vmem:[%s918_s0 + $0x48] sm:$0xff]  ;;  %v25_v41 = vld [vmem:[%s918_s0 + $0x58] sm:$0xff]  ;;  %v22_v42 = vld [vmem:[%s918_s0 + $0x40] sm:$0xff] }
  0x1a   :  { %508 = vmatprep.subr.bf16.mxu0 %v507_v14  ;;  %v24_v43 = vld [vmem:[%s918_s0 + $0x50] sm:$0xff]  ;;  %v27_v44 = vld [vmem:[%s918_s0 + $0x68] sm:$0xff]  ;;  %v29_v45 = vld [vmem:[%s918_s0 + $0x78] sm:$0xff] }
  0x1b   :  { %538 = vmatpush3.bf16.msra.mxu1 %v537_v13  ;;  %v26_v46 = vld [vmem:[%s918_s0 + $0x60] sm:$0xff]  ;;  %v28_v47 = vld [vmem:[%s918_s0 + $0x70] sm:$0xff]  ;;  %v31_v48 = vld [vmem:[%s918_s0 + $0x88] sm:$0xff] }
  0x1c   :  { %540 = vmatprep.subr.bf16.mxu1 %v539_v18  ;;  %v33_v49 = vld [vmem:[%s918_s0 + $0x98] sm:$0xff]  ;;  %v30_v50 = vld [vmem:[%s918_s0 + $0x80] sm:$0xff]  ;;  %v32_v51 = vld [vmem:[%s918_s0 + $0x90] sm:$0xff] }
  0x1d   :  { %510 = vmatpush3.bf16.msra.mxu0 %v509_v24  ;;  %v35_v52 = vld [vmem:[%s918_s0 + $0xa8] sm:$0xff]  ;;  %v37_v53 = vld [vmem:[%s918_s0 + $0xb8] sm:$0xff]  ;;  %v34_v54 = vld [vmem:[%s918_s0 + $0xa0] sm:$0xff] }
  0x1e   :  { %512 = vmatprep.subr.bf16.mxu0 %v511_v26  ;;  %v36_v55 = vld [vmem:[%s918_s0 + $0xb0] sm:$0xff]  ;;  %v39_v56 = vld [vmem:[%s918_s0 + $0xc8] sm:$0xff]  ;;  %v41_v57 = vld [vmem:[%s918_s0 + $0xd8] sm:$0xff] }
  0x1f   :  { %542 = vmatpush3.bf16.msra.mxu1 %v541_v25  ;;  %v38_v58 = vld [vmem:[%s918_s0 + $0xc0] sm:$0xff]  ;;  %v40_v59 = vld [vmem:[%s918_s0 + $0xd0] sm:$0xff]  ;;  %v43_v60 = vld [vmem:[%s918_s0 + $0xe8] sm:$0xff] }
  0x20   :  { %544 = vmatprep.subr.bf16.mxu1 %v543_v29  ;;  %v45_v61 = vld [vmem:[%s918_s0 + $0xf8] sm:$0xff]  ;;  %v42_v62 = vld [vmem:[%s918_s0 + $0xe0] sm:$0xff]  ;;  %v44_v63 = vld [vmem:[%s918_s0 + $0xf0] sm:$0xff] }
  0x21   :  { %514 = vmatpush3.bf16.msra.mxu0 %v513_v32  ;;  %v47_v0 = vld [vmem:[%s918_s0 + $0x108] sm:$0xff]  ;;  %v49_v1 = vld [vmem:[%s918_s0 + $0x118] sm:$0xff]  ;;  %v46_v2 = vld [vmem:[%s918_s0 + $0x100] sm:$0xff] }
  0x22   :  { %v48_v3 = vld [vmem:[%s918_s0 + $0x110] sm:$0xff]  ;;  %v870_v5 = vld [vmem:[%s919_s2] ss:$0 sm:$0xff] }
  0x23   :  { %546 = vmatpush3.bf16.msra.mxu1 %v545_v33 }
  0x24   :  { %186 = vmatmul.mubr.f32.vlgmr.msra.gmra.mrb[0].mxu0 %v14_v34 }
  0x25   :  { %190 = vmatprep.mubr.f32.mxu0 %v19_v36 }
  0x26   :  { %296 = vmatmul.mubr.f32.vlgmr.msra.gmra.mrb[0].mxu1 %v16_v35 }
  0x27   :  { %300 = vmatprep.mubr.f32.mxu1 %v21_v37 }
  0x28   :  { %191 = vmatmul.mubr.f32.gmra.mrb[2].mxu0 %v18_v38 }
  0x29   :  { %195 = vmatprep.mubr.f32.mxu0 %v23_v40 }
  0x2a   :  { %301 = vmatmul.mubr.f32.gmra.mrb[2].mxu1 %v20_v39 }
  0x2b   :  { %305 = vmatprep.mubr.f32.mxu1 %v25_v41 }
  0x2c   :  { %196 = vmatmul.mubr.f32.gmra.mrb[4].mxu0 %v22_v42 }
  0x2d   :  { %200 = vmatprep.mubr.f32.mxu0 %v27_v44 }
  0x2e   :  { %306 = vmatmul.mubr.f32.gmra.mrb[4].mxu1 %v24_v43 }
  0x2f   :  { %310 = vmatprep.mubr.f32.mxu1 %v29_v45 }
  0x30   :  { %201 = vmatmul.mubr.f32.gmra.mrb[6].mxu0 %v26_v46 }
  0x31   :  { %205 = vmatprep.mubr.f32.mxu0 %v31_v48 }
  0x32   :  { %311 = vmatmul.mubr.f32.gmra.mrb[6].mxu1 %v28_v47 }
  0x33   :  { %315 = vmatprep.mubr.f32.mxu1 %v33_v49 }
  0x34   :  { %206 = vmatmul.mubr.f32.gmra.mrb[8].mxu0 %v30_v50 }
  0x35   :  { %210 = vmatprep.mubr.f32.mxu0 %v35_v52 }
  0x36   :  { %316 = vmatmul.mubr.f32.gmra.mrb[8].mxu1 %v32_v51 }
  0x37   :  { %320 = vmatprep.mubr.f32.mxu1 %v37_v53 }
  0x38   :  { %211 = vmatmul.mubr.f32.gmra.mrb[10].mxu0 %v34_v54 }
  0x39   :  { %215 = vmatprep.mubr.f32.mxu0 %v39_v56 }
  0x3a   :  { %321 = vmatmul.mubr.f32.gmra.mrb[10].mxu1 %v36_v55 }
  0x3b   :  { %325 = vmatprep.mubr.f32.mxu1 %v41_v57 }
  0x3c   :  { %216 = vmatmul.mubr.f32.gmra.mrb[12].mxu0 %v38_v58 }
  0x3d   :  { %220 = vmatprep.mubr.f32.mxu0 %v43_v60 }
  0x3e   :  { %326 = vmatmul.mubr.f32.gmra.mrb[12].mxu1 %v40_v59 }
  0x3f   :  { %330 = vmatprep.mubr.f32.mxu1 %v45_v61 }
  0x40   :  { %221 = vmatmul.mubr.f32.gmra.mrb[14].mxu0 %v42_v62 }
  0x41   :  { %225 = vmatprep.mubr.f32.mxu0 %v47_v0 }
  0x42   :  { %331 = vmatmul.mubr.f32.gmra.mrb[14].mxu1 %v44_v63 }
  0x43   :  { %335 = vmatprep.mubr.f32.mxu1 %v49_v1 }
  0x44   :  { %226 = vmatmul.mubr.f32.gmra.mrb[16].mxu0 %v46_v2 }
  0x46   :  { %336 = vmatmul.mubr.f32.gmra.mrb[16].mxu1 %v48_v3 }
  0xf7   :  { %v397_v4 = vpop.f32.mrb[0].mxu0 }
  0xf8   :  { %v398_v6 = vpop.f32.mrb[1].mxu0 }
  0xf9   :  { %v456_v7 = vpop.f32.mrb[0].mxu1  ;;  %v399_v8 = vadd.f32 %v398_v6, %v397_v4 }
  0xfa   :  { %v457_v9 = vpop.f32.mrb[1].mxu1 }
  0xfb   :  { %v458_v10 = vadd.f32 %v457_v9, %v456_v7  ;;  %v188_v11 = vadd.f32 %v399_v8, %v870_v5  ;;  %v400_v12 = vpop.f32.mrb[2].mxu0 }
  0xfc   :  { %v401_v13 = vpop.f32.mrb[3].mxu0 }
  0xfd   :  { %v459_v14 = vpop.f32.mrb[2].mxu1  ;;  %v298_v15 = vadd.f32 %v458_v10, %v188_v11  ;;  %v402_v16 = vadd.f32 %v401_v13, %v400_v12 }
  0xfe   :  { %v460_v17 = vpop.f32.mrb[3].mxu1 }
  0xff   :  { %v461_v18 = vadd.f32 %v460_v17, %v459_v14  ;;  %v341_v19 = vmax.f32 %v298_v15, 0.0  ;;  %v193_v20 = vadd.f32 %v402_v16, %v870_v5  ;;  %v403_v21 = vpop.f32.mrb[4].mxu0 }
 0x100   :  { %v404_v22 = vpop.f32.mrb[5].mxu0 }
 0x101   :  { %v462_v23 = vpop.f32.mrb[4].mxu1  ;;  %351 = vst.msk [vmem:[%s920_s3] sm:$0xff] %vm350_vm0, %v341_v19  ;;  %v303_v24 = vadd.f32 %v461_v18, %v193_v20  ;;  %v405_v25 = vadd.f32 %v404_v22, %v403_v21 }
 0x102   :  { %v463_v26 = vpop.f32.mrb[5].mxu1 }
 0x103   :  { %v464_v27 = vadd.f32 %v463_v26, %v462_v23  ;;  %v342_v28 = vmax.f32 %v303_v24, 0.0  ;;  %v198_v29 = vadd.f32 %v405_v25, %v870_v5  ;;  %v406_v30 = vpop.f32.mrb[6].mxu0 }
 0x104   :  { %v407_v31 = vpop.f32.mrb[7].mxu0 }
 0x105   :  { %v465_v32 = vpop.f32.mrb[6].mxu1  ;;  %352 = vst.msk [vmem:[%s920_s3 + $0x8] sm:$0xff] %vm350_vm0, %v342_v28  ;;  %v308_v33 = vadd.f32 %v464_v27, %v198_v29  ;;  %v408_v34 = vadd.f32 %v407_v31, %v406_v30 }
 0x106   :  { %v466_v35 = vpop.f32.mrb[7].mxu1 }
 0x107   :  { %v467_v36 = vadd.f32 %v466_v35, %v465_v32  ;;  %v343_v37 = vmax.f32 %v308_v33, 0.0  ;;  %v203_v38 = vadd.f32 %v408_v34, %v870_v5  ;;  %v409_v39 = vpop.f32.mrb[8].mxu0 }
 0x108   :  { %v410_v40 = vpop.f32.mrb[9].mxu0 }
 0x109   :  { %v468_v41 = vpop.f32.mrb[8].mxu1  ;;  %353 = vst.msk [vmem:[%s920_s3 + $0x10] sm:$0xff] %vm350_vm0, %v343_v37  ;;  %v313_v42 = vadd.f32 %v467_v36, %v203_v38  ;;  %v411_v43 = vadd.f32 %v410_v40, %v409_v39 }
 0x10a   :  { %v469_v44 = vpop.f32.mrb[9].mxu1 }
 0x10b   :  { %v470_v45 = vadd.f32 %v469_v44, %v468_v41  ;;  %v344_v46 = vmax.f32 %v313_v42, 0.0  ;;  %v208_v47 = vadd.f32 %v411_v43, %v870_v5  ;;  %v412_v48 = vpop.f32.mrb[10].mxu0 }
 0x10c   :  { %v413_v49 = vpop.f32.mrb[11].mxu0 }
 0x10d   :  { %v471_v50 = vpop.f32.mrb[10].mxu1  ;;  %354 = vst.msk [vmem:[%s920_s3 + $0x18] sm:$0xff] %vm350_vm0, %v344_v46  ;;  %v318_v51 = vadd.f32 %v470_v45, %v208_v47  ;;  %v414_v52 = vadd.f32 %v413_v49, %v412_v48 }
 0x10e   :  { %v472_v53 = vpop.f32.mrb[11].mxu1 }
 0x10f   :  { %v473_v54 = vadd.f32 %v472_v53, %v471_v50  ;;  %v345_v55 = vmax.f32 %v318_v51, 0.0  ;;  %v213_v56 = vadd.f32 %v414_v52, %v870_v5  ;;  %v415_v57 = vpop.f32.mrb[12].mxu0 }
 0x110   :  { %v416_v58 = vpop.f32.mrb[13].mxu0 }
 0x111   :  { %v474_v59 = vpop.f32.mrb[12].mxu1  ;;  %355 = vst.msk [vmem:[%s920_s3 + $0x20] sm:$0xff] %vm350_vm0, %v345_v55  ;;  %v323_v60 = vadd.f32 %v473_v54, %v213_v56  ;;  %v417_v61 = vadd.f32 %v416_v58, %v415_v57 }
 0x112   :  { %v475_v62 = vpop.f32.mrb[13].mxu1 }
 0x113   :  { %v476_v63 = vadd.f32 %v475_v62, %v474_v59  ;;  %v346_v0 = vmax.f32 %v323_v60, 0.0  ;;  %v218_v1 = vadd.f32 %v417_v61, %v870_v5  ;;  %v418_v2 = vpop.f32.mrb[14].mxu0 }
 0x114   :  { %v419_v3 = vpop.f32.mrb[15].mxu0 }
 0x115   :  { %v477_v4 = vpop.f32.mrb[14].mxu1  ;;  %356 = vst.msk [vmem:[%s920_s3 + $0x28] sm:$0xff] %vm350_vm0, %v346_v0  ;;  %v328_v6 = vadd.f32 %v476_v63, %v218_v1  ;;  %v420_v7 = vadd.f32 %v419_v3, %v418_v2 }
 0x116   :  { %v478_v8 = vpop.f32.mrb[15].mxu1 }
 0x117   :  { %v479_v9 = vadd.f32 %v478_v8, %v477_v4  ;;  %v347_v10 = vmax.f32 %v328_v6, 0.0  ;;  %v223_v11 = vadd.f32 %v420_v7, %v870_v5  ;;  %v421_v12 = vpop.f32.mrb[16].mxu0 }
 0x118   :  { %v422_v13 = vpop.f32.mrb[17].mxu0 }
 0x119   :  { %v480_v14 = vpop.f32.mrb[16].mxu1  ;;  %357 = vst.msk [vmem:[%s920_s3 + $0x30] sm:$0xff] %vm350_vm0, %v347_v10  ;;  %v333_v15 = vadd.f32 %v479_v9, %v223_v11  ;;  %v423_v16 = vadd.f32 %v422_v13, %v421_v12 }
 0x11a   :  { %v481_v17 = vpop.f32.mrb[17].mxu1 }
 0x11b   :  { %v482_v18 = vadd.f32 %v481_v17, %v480_v14  ;;  %v348_v19 = vmax.f32 %v333_v15, 0.0  ;;  %v228_v20 = vadd.f32 %v423_v16, %v870_v5 }
 0x11d   :  { %358 = vst.msk [vmem:[%s920_s3 + $0x38] sm:$0xff] %vm350_vm0, %v348_v19  ;;  %v338_v21 = vadd.f32 %v482_v18, %v228_v20 }
 0x11f   :  { %v349_v22 = vmax.f32 %v338_v21, 0.0 }
 0x121   :  { %359 = vst.msk [vmem:[%s920_s3 + $0x40] sm:$0xff] %vm350_vm0, %v349_v22 }

// kernel: pointnav_baseline_net_forward.6
= control target key start
LH: loop header
LB: loop body
LE: loop exit
PB: predicated region body
PF: predicated region fallthrough
CT: control target
= control target key end

     0   :  { %vm113_vm0 = vcmask 523264   ;;  %vm381_vm1 = vcmask 261120   ;;  %s916_s1 = inlined_call_operand.vmem [shape: f32[576,32], index: 1, kind: input, shape index: {}]   ;;  %s917_s0 = inlined_call_operand.vmem [shape: f32[32,576], index: 0, kind: input, shape index: {}]   ;;  %s918_s2 = inlined_call_operand.vmem [shape: f32[1,32], index: 2, kind: input, shape index: {}]   ;;  %s919_s3 = inlined_call_operand.vmem [shape: f32[32,32], index: 3, kind: output, shape index: {}]  }
   0x1   :  { %v50_v0 = vld [vmem:[%s916_s1 + $0x80] sm:$0xff]  ;;  %v51_v1 = vld [vmem:[%s916_s1 + $0x88] sm:$0xff]  ;;  %v52_v11 = vld [vmem:[%s916_s1 + $0x90] sm:$0xff] }
   0x2   :  { %v82_v2 = vld [vmem:[%s916_s1 + $0x180] sm:$0xff]  ;;  %v517_v3 = vpack.c.bf16 %v51_v1, %v50_v0  ;;  %v83_v4 = vld [vmem:[%s916_s1 + $0x188] sm:$0xff]  ;;  %v53_v13 = vld [vmem:[%s916_s1 + $0x98] sm:$0xff] }
   0x3   :  { %v34_v5 = vld [vmem:[%s916_s1] sm:$0xff]  ;;  %v35_v6 = vld [vmem:[%s916_s1 + $0x8] sm:$0xff]  ;;  %v549_v7 = vpack.c.bf16 %v83_v4, %v82_v2  ;;  %v84_v14 = vld [vmem:[%s916_s1 + $0x190] sm:$0xff]  ;;  %v521_v16 = vpack.c.bf16 %v53_v13, %v52_v11 }
   0x4   :  { %v519_v8 = vpack.c.bf16 %v35_v6, %v34_v5  ;;  %v66_v9 = vld [vmem:[%s916_s1 + $0x100] sm:$0xff]  ;;  %v67_v10 = vld [vmem:[%s916_s1 + $0x108] sm:$0xff]  ;;  %518 = vmatprep.subr.bf16.mxu0 %v517_v3  ;;  %v85_v15 = vld [vmem:[%s916_s1 + $0x198] sm:$0xff] }
   0x5   :  { %v551_v12 = vpack.c.bf16 %v67_v10, %v66_v9  ;;  %550 = vmatprep.subr.bf16.mxu1 %v549_v7  ;;  %v553_v17 = vpack.c.bf16 %v85_v15, %v84_v14  ;;  %v36_v18 = vld [vmem:[%s916_s1 + $0x10] sm:$0xff]  ;;  %v37_v19 = vld [vmem:[%s916_s1 + $0x18] sm:$0xff]  ;;  %v54_v23 = vld [vmem:[%s916_s1 + $0xa0] sm:$0xff] }
   0x6   :  { %520 = vmatpush3.bf16.msra.mxu0 %v519_v8  ;;  %v68_v20 = vld [vmem:[%s916_s1 + $0x110] sm:$0xff]  ;;  %v523_v21 = vpack.c.bf16 %v37_v19, %v36_v18  ;;  %v69_v22 = vld [vmem:[%s916_s1 + $0x118] sm:$0xff]  ;;  %v55_v24 = vld [vmem:[%s916_s1 + $0xa8] sm:$0xff] }
   0x7   :  { %552 = vmatpush3.bf16.msra.mxu1 %v551_v12  ;;  %522 = vmatprep.subr.bf16.mxu0 %v521_v16  ;;  %v555_v25 = vpack.c.bf16 %v69_v22, %v68_v20  ;;  %v525_v26 = vpack.c.bf16 %v55_v24, %v54_v23  ;;  %v86_v27 = vld [vmem:[%s916_s1 + $0x1a0] sm:$0xff]  ;;  %v87_v28 = vld [vmem:[%s916_s1 + $0x1a8] sm:$0xff]  ;;  %v56_v35 = vld [vmem:[%s916_s1 + $0xb0] sm:$0xff] }
   0x8   :  { %554 = vmatprep.subr.bf16.mxu1 %v553_v17  ;;  %v38_v29 = vld [vmem:[%s916_s1 + $0x20] sm:$0xff]  ;;  %v557_v30 = vpack.c.bf16 %v87_v28, %v86_v27  ;;  %v39_v31 = vld [vmem:[%s916_s1 + $0x28] sm:$0xff]  ;;  %v57_v36 = vld [vmem:[%s916_s1 + $0xb8] sm:$0xff] }
   0x9   :  { %v70_v32 = vld [vmem:[%s916_s1 + $0x120] sm:$0xff]  ;;  %v71_v33 = vld [vmem:[%s916_s1 + $0x128] sm:$0xff]  ;;  %v527_v34 = vpack.c.bf16 %v39_v31, %v38_v29  ;;  %v88_v37 = vld [vmem:[%s916_s1 + $0x1b0] sm:$0xff]  ;;  %v529_v39 = vpack.c.bf16 %v57_v36, %v56_v35 }
   0xa   :  { %524 = vmatpush3.bf16.msra.mxu0 %v523_v21  ;;  %v559_v38 = vpack.c.bf16 %v71_v33, %v70_v32  ;;  %v89_v40 = vld [vmem:[%s916_s1 + $0x1b8] sm:$0xff]  ;;  %v40_v41 = vld [vmem:[%s916_s1 + $0x30] sm:$0xff]  ;;  %v58_v46 = vld [vmem:[%s916_s1 + $0xc0] sm:$0xff] }
   0xb   :  { %556 = vmatpush3.bf16.msra.mxu1 %v555_v25  ;;  %526 = vmatprep.subr.bf16.mxu0 %v525_v26  ;;  %v41_v42 = vld [vmem:[%s916_s1 + $0x38] sm:$0xff]  ;;  %v561_v43 = vpack.c.bf16 %v89_v40, %v88_v37  ;;  %v72_v44 = vld [vmem:[%s916_s1 + $0x130] sm:$0xff]  ;;  %v59_v47 = vld [vmem:[%s916_s1 + $0xc8] sm:$0xff] }
   0xc   :  { %558 = vmatprep.subr.bf16.mxu1 %v557_v30  ;;  %v73_v45 = vld [vmem:[%s916_s1 + $0x138] sm:$0xff]  ;;  %v90_v48 = vld [vmem:[%s916_s1 + $0x1c0] sm:$0xff]  ;;  %v91_v49 = vld [vmem:[%s916_s1 + $0x1c8] sm:$0xff]  ;;  %v531_v50 = vpack.c.bf16 %v41_v42, %v40_v41  ;;  %v533_v52 = vpack.c.bf16 %v59_v47, %v58_v46 }
   0xd   :  { %v563_v51 = vpack.c.bf16 %v73_v45, %v72_v44  ;;  %v42_v53 = vld [vmem:[%s916_s1 + $0x40] sm:$0xff]  ;;  %v43_v54 = vld [vmem:[%s916_s1 + $0x48] sm:$0xff]  ;;  %v565_v56 = vpack.c.bf16 %v91_v49, %v90_v48  ;;  %v60_v58 = vld [vmem:[%s916_s1 + $0xd0] sm:$0xff] }
   0xe   :  { %528 = vmatpush3.bf16.msra.mxu0 %v527_v34  ;;  %v74_v55 = vld [vmem:[%s916_s1 + $0x140] sm:$0xff]  ;;  %v75_v57 = vld [vmem:[%s916_s1 + $0x148] sm:$0xff]  ;;  %v61_v59 = vld [vmem:[%s916_s1 + $0xd8] sm:$0xff]  ;;  %v535_v62 = vpack.c.bf16 %v43_v54, %v42_v53 }
   0xf   :  { %560 = vmatpush3.bf16.msra.mxu1 %v559_v38  ;;  %530 = vmatprep.subr.bf16.mxu0 %v529_v39  ;;  %v92_v60 = vld [vmem:[%s916_s1 + $0x1d0] sm:$0xff]  ;;  %v93_v61 = vld [vmem:[%s916_s1 + $0x1d8] sm:$0xff]  ;;  %v567_v63 = vpack.c.bf16 %v75_v57, %v74_v55  ;;  %v537_v0 = vpack.c.bf16 %v61_v59, %v60_v58  ;;  %v62_v6 = vld [vmem:[%s916_s1 + $0xe0] sm:$0xff] }
  0x10   :  { %562 = vmatprep.subr.bf16.mxu1 %v561_v43  ;;  %v44_v1 = vld [vmem:[%s916_s1 + $0x50] sm:$0xff]  ;;  %v45_v2 = vld [vmem:[%s916_s1 + $0x58] sm:$0xff]  ;;  %v569_v4 = vpack.c.bf16 %v93_v61, %v92_v60  ;;  %v63_v7 = vld [vmem:[%s916_s1 + $0xe8] sm:$0xff] }
  0x11   :  { %v76_v3 = vld [vmem:[%s916_s1 + $0x150] sm:$0xff]  ;;  %v77_v5 = vld [vmem:[%s916_s1 + $0x158] sm:$0xff]  ;;  %v94_v8 = vld [vmem:[%s916_s1 + $0x1e0] sm:$0xff]  ;;  %v539_v10 = vpack.c.bf16 %v45_v2, %v44_v1  ;;  %v541_v14 = vpack.c.bf16 %v63_v7, %v62_v6 }
  0x12   :  { %532 = vmatpush3.bf16.msra.mxu0 %v531_v50  ;;  %v95_v9 = vld [vmem:[%s916_s1 + $0x1e8] sm:$0xff]  ;;  %v46_v11 = vld [vmem:[%s916_s1 + $0x60] sm:$0xff]  ;;  %v571_v13 = vpack.c.bf16 %v77_v5, %v76_v3  ;;  %v17_v17 = vld [vmem:[%s917_s0 + $0x18] sm:$0xff] }
  0x13   :  { %564 = vmatpush3.bf16.msra.mxu1 %v563_v51  ;;  %534 = vmatprep.subr.bf16.mxu0 %v533_v52  ;;  %v47_v12 = vld [vmem:[%s916_s1 + $0x68] sm:$0xff]  ;;  %v78_v15 = vld [vmem:[%s916_s1 + $0x160] sm:$0xff]  ;;  %v573_v18 = vpack.c.bf16 %v95_v9, %v94_v8  ;;  %v64_v20 = vld [vmem:[%s916_s1 + $0xf0] sm:$0xff] }
  0x14   :  { %566 = vmatprep.subr.bf16.mxu1 %v565_v56  ;;  %v15_v16 = vld [vmem:[%s917_s0 + $0x8] sm:$0xff]  ;;  %v65_v21 = vld [vmem:[%s916_s1 + $0xf8] sm:$0xff]  ;;  %v96_v22 = vld [vmem:[%s916_s1 + $0x1f0] sm:$0xff]  ;;  %275 = vmatprep.mubr.f32.mxu1 %v17_v17  ;;  %v543_v24 = vpack.c.bf16 %v47_v12, %v46_v11 }
  0x15   :  { %v79_v19 = vld [vmem:[%s916_s1 + $0x168] sm:$0xff]  ;;  %190 = vmatprep.mubr.f32.mxu0 %v15_v16  ;;  %v97_v23 = vld [vmem:[%s916_s1 + $0x1f8] sm:$0xff]  ;;  %v545_v26 = vpack.c.bf16 %v65_v21, %v64_v20  ;;  %v48_v27 = vld [vmem:[%s916_s1 + $0x70] sm:$0xff] }
  0x16   :  { %536 = vmatpush3.bf16.msra.mxu0 %v535_v62  ;;  %v575_v25 = vpack.c.bf16 %v79_v19, %v78_v15  ;;  %v49_v28 = vld [vmem:[%s916_s1 + $0x78] sm:$0xff]  ;;  %v80_v29 = vld [vmem:[%s916_s1 + $0x170] sm:$0xff]  ;;  %v577_v30 = vpack.c.bf16 %v97_v23, %v96_v22  ;;  %v98_v32 = vld [vmem:[%s916_s1 + $0x200] sm:$0xff] }
  0x17   :  { %568 = vmatpush3.bf16.msra.mxu1 %v567_v63  ;;  %538 = vmatprep.subr.bf16.mxu0 %v537_v0  ;;  %v81_v31 = vld [vmem:[%s916_s1 + $0x178] sm:$0xff]  ;;  %v99_v33 = vld [vmem:[%s916_s1 + $0x208] sm:$0xff]  ;;  %v547_v34 = vpack.c.bf16 %v49_v28, %v48_v27  ;;  %v100_v37 = vld [vmem:[%s916_s1 + $0x210] sm:$0xff] }
  0x18   :  { %570 = vmatprep.subr.bf16.mxu1 %v569_v4  ;;  %v579_v35 = vpack.c.bf16 %v81_v31, %v80_v29  ;;  %v581_v36 = vpack.c.bf16 %v99_v33, %v98_v32  ;;  %v101_v38 = vld [vmem:[%s916_s1 + $0x218] sm:$0xff]  ;;  %v14_v39 = vld [vmem:[%s917_s0] sm:$0xff]  ;;  %v16_v40 = vld [vmem:[%s917_s0 + $0x10] sm:$0xff] }
  0x19   :  { %v20_v41 = vld [vmem:[%s917_s0 + $0x30] sm:$0xff]  ;;  %v585_v42 = vpack.c.bf16 %v101_v38, %v100_v37  ;;  %v22_v43 = vld [vmem:[%s917_s0 + $0x40] sm:$0xff]  ;;  %v103_v45 = vld [vmem:[%s916_s1 + $0x228] sm:$0xff] }
  0x1a   :  { %540 = vmatpush3.bf16.msra.mxu0 %v539_v10  ;;  %v102_v44 = vld [vmem:[%s916_s1 + $0x220] sm:$0xff]  ;;  %v19_v46 = vld [vmem:[%s917_s0 + $0x28] sm:$0xff]  ;;  %v21_v47 = vld [vmem:[%s917_s0 + $0x38] sm:$0xff] }
  0x1b   :  { %572 = vmatpush3.bf16.msra.mxu1 %v571_v13  ;;  %542 = vmatprep.subr.bf16.mxu0 %v541_v14  ;;  %v25_v48 = vld [vmem:[%s917_s0 + $0x58] sm:$0xff]  ;;  %v589_v49 = vpack.c.bf16 %v103_v45, %v102_v44  ;;  %v27_v50 = vld [vmem:[%s917_s0 + $0x68] sm:$0xff]  ;;  %v104_v51 = vld [vmem:[%s916_s1 + $0x230] sm:$0xff] }
  0x1c   :  { %574 = vmatprep.subr.bf16.mxu1 %v573_v18  ;;  %v105_v52 = vld [vmem:[%s916_s1 + $0x238] sm:$0xff]  ;;  %v24_v53 = vld [vmem:[%s917_s0 + $0x50] sm:$0xff]  ;;  %v26_v54 = vld [vmem:[%s917_s0 + $0x60] sm:$0xff] }
  0x1d   :  { %v30_v55 = vld [vmem:[%s917_s0 + $0x80] sm:$0xff]  ;;  %v593_v56 = vpack.c.bf16 %v105_v52, %v104_v51  ;;  %v32_v57 = vld [vmem:[%s917_s0 + $0x90] sm:$0xff]  ;;  %v29_v58 = vld [vmem:[%s917_s0 + $0x78] sm:$0xff] }
  0x1e   :  { %544 = vmatpush3.bf16.msra.mxu0 %v543_v24  ;;  %v31_v59 = vld [vmem:[%s917_s0 + $0x88] sm:$0xff]  ;;  %v18_v60 = vld [vmem:[%s917_s0 + $0x20] sm:$0xff]  ;;  %v28_v61 = vld [vmem:[%s917_s0 + $0x70] sm:$0xff] }
  0x1f   :  { %576 = vmatpush3.bf16.msra.mxu1 %v575_v25  ;;  %546 = vmatprep.subr.bf16.mxu0 %v545_v26  ;;  %v23_v62 = vld [vmem:[%s917_s0 + $0x48] sm:$0xff]  ;;  %v33_v63 = vld [vmem:[%s917_s0 + $0x98] sm:$0xff]  ;;  %v390_v1 = vld [vmem:[%s918_s2] ss:$0 sm:$0xff] }
  0x20   :  { %578 = vmatprep.subr.bf16.mxu1 %v577_v30 }
  0x22   :  { %548 = vmatpush3.bf16.msra.mxu0 %v547_v34 }
  0x23   :  { %580 = vmatpush3.bf16.msra.mxu1 %v579_v35  ;;  %582 = vmatprep.subr.bf16.mxu0 %v581_v36 }
  0x24   :  { %597 = vmatprep.subr.bf16.mxu1 %v581_v36 }
  0x25   :  { %191 = vmatmul.mubr.f32.vlgmr.msra.gmra.mrb[0].mxu0 %v14_v39 }
  0x26   :  { %276 = vmatmul.mubr.f32.vlgmr.msra.gmra.mrb[0].mxu1 %v16_v40  ;;  %584 = vmatpush3.bf16.msra.mxu0 %v581_v36 }
  0x27   :  { %601 = vmatpush3.bf16.msra.mxu1 %v581_v36  ;;  %195 = vmatprep.mubr.f32.mxu0 %v20_v41 }
  0x28   :  { %280 = vmatprep.mubr.f32.mxu1 %v22_v43  ;;  %586 = vmatprep.subr.bf16.mxu0 %v585_v42 }
  0x29   :  { %196 = vmatmul.mubr.f32.gmra.mrb[2].mxu0 %v19_v46  ;;  %598 = vmatprep.subr.bf16.mxu1 %v585_v42 }
  0x2a   :  { %281 = vmatmul.mubr.f32.gmra.mrb[2].mxu1 %v21_v47  ;;  %588 = vmatpush3.bf16.msra.mxu0 %v585_v42 }
  0x2b   :  { %602 = vmatpush3.bf16.msra.mxu1 %v585_v42  ;;  %200 = vmatprep.mubr.f32.mxu0 %v25_v48 }
  0x2c   :  { %285 = vmatprep.mubr.f32.mxu1 %v27_v50  ;;  %590 = vmatprep.subr.bf16.mxu0 %v589_v49 }
  0x2d   :  { %201 = vmatmul.mubr.f32.gmra.mrb[4].mxu0 %v24_v53  ;;  %599 = vmatprep.subr.bf16.mxu1 %v589_v49 }
  0x2e   :  { %286 = vmatmul.mubr.f32.gmra.mrb[4].mxu1 %v26_v54  ;;  %592 = vmatpush3.bf16.msra.mxu0 %v589_v49 }
  0x2f   :  { %603 = vmatpush3.bf16.msra.mxu1 %v589_v49  ;;  %205 = vmatprep.mubr.f32.mxu0 %v30_v55 }
  0x30   :  { %290 = vmatprep.mubr.f32.mxu1 %v32_v57  ;;  %594 = vmatprep.subr.bf16.mxu0 %v593_v56 }
  0x31   :  { %206 = vmatmul.mubr.f32.gmra.mrb[6].mxu0 %v29_v58  ;;  %600 = vmatprep.subr.bf16.mxu1 %v593_v56 }
  0x32   :  { %291 = vmatmul.mubr.f32.gmra.mrb[6].mxu1 %v31_v59  ;;  %596 = vmatpush3.bf16.msra.mxu0 %v593_v56 }
  0x33   :  { %604 = vmatpush3.bf16.msra.mxu1 %v593_v56  ;;  %511 = vmatprep.mubr.msk.f32.mxu0 %vm113_vm0, %v18_v60 }
  0x34   :  { %514 = vmatprep.mubr.msk.f32.mxu1 %vm113_vm0, %v28_v61 }
  0x35   :  { %512 = vmatmul.mubr.msk.f32.vlgmr.msra.gmra.mrb[8].mxu0 %vm113_vm0, %v23_v62 }
  0x36   :  { %515 = vmatmul.mubr.msk.f32.vlgmr.msra.gmra.mrb[8].mxu1 %vm113_vm0, %v33_v63 }
  0xf8   :  { %v427_v0 = vpop.f32.mrb[0].mxu0 }
  0xf9   :  { %v428_v2 = vpop.f32.mrb[1].mxu0  ;;  %v471_v3 = vpop.f32.mrb[0].mxu1 }
  0xfa   :  { %v429_v4 = vadd.f32 %v428_v2, %v427_v0  ;;  %v472_v5 = vpop.f32.mrb[1].mxu1 }
  0xfb   :  { %v473_v6 = vadd.f32 %v472_v5, %v471_v3 }
  0xfc   :  { %v193_v7 = vadd.f32 %v429_v4, %v390_v1  ;;  %v430_v8 = vpop.f32.mrb[2].mxu0 }
  0xfd   :  { %v431_v9 = vpop.f32.mrb[3].mxu0  ;;  %v474_v10 = vpop.f32.mrb[2].mxu1 }
  0xfe   :  { %v432_v11 = vadd.f32 %v431_v9, %v430_v8  ;;  %v475_v12 = vpop.f32.mrb[3].mxu1  ;;  %v278_v13 = vadd.f32 %v473_v6, %v193_v7 }
  0xff   :  { %v476_v14 = vadd.f32 %v475_v12, %v474_v10 }
 0x100   :  { %v198_v15 = vadd.f32 %v432_v11, %v390_v1  ;;  %v433_v16 = vpop.f32.mrb[4].mxu0 }
 0x101   :  { %v434_v17 = vpop.f32.mrb[5].mxu0  ;;  %v477_v18 = vpop.f32.mrb[4].mxu1 }
 0x102   :  { %v435_v19 = vadd.f32 %v434_v17, %v433_v16  ;;  %v478_v20 = vpop.f32.mrb[5].mxu1  ;;  %v283_v21 = vadd.f32 %v476_v14, %v198_v15 }
 0x103   :  { %v479_v22 = vadd.f32 %v478_v20, %v477_v18 }
 0x104   :  { %v203_v23 = vadd.f32 %v435_v19, %v390_v1  ;;  %v436_v24 = vpop.f32.mrb[6].mxu0 }
 0x105   :  { %v437_v25 = vpop.f32.mrb[7].mxu0  ;;  %v480_v26 = vpop.f32.mrb[6].mxu1 }
 0x106   :  { %v438_v27 = vadd.f32 %v437_v25, %v436_v24  ;;  %v481_v28 = vpop.f32.mrb[7].mxu1  ;;  %v288_v29 = vadd.f32 %v479_v22, %v203_v23 }
 0x107   :  { %v482_v30 = vadd.f32 %v481_v28, %v480_v26 }
 0x108   :  { %v208_v31 = vadd.f32 %v438_v27, %v390_v1  ;;  %v513_v32 = vpop.f32.mrb[8].mxu0 }
 0x109   :  { %v368_v33 = vadd.f32 %v513_v32, %v283_v21  ;;  %v516_v34 = vpop.f32.mrb[8].mxu1  ;;  %v362_v35 = vpop.f32.mrb[9].mxu0 }
 0x10a   :  { %v293_v36 = vadd.f32 %v482_v30, %v208_v31  ;;  %v363_v37 = vadd.f32 %v362_v35, %v278_v13  ;;  %v372_v38 = vpop.f32.mrb[9].mxu1 }
 0x10b   :  { %383 = vst.msk [vmem:[%s919_s3 + $0x8] sm:$0xff] %vm381_vm1, %v368_v33  ;;  %v373_v39 = vadd.f32 %v372_v38, %v288_v29 }
 0x10c   :  { %v378_v40 = vadd.f32 %v516_v34, %v293_v36  ;;  %382 = vst.msk [vmem:[%s919_s3] sm:$0xff] %vm381_vm1, %v363_v37 }
 0x10d   :  { %384 = vst.msk [vmem:[%s919_s3 + $0x10] sm:$0xff] %vm381_vm1, %v373_v39 }
 0x10e   :  { %385 = vst.msk [vmem:[%s919_s3 + $0x18] sm:$0xff] %vm381_vm1, %v378_v40 }

// kernel: pointnav_baseline_net_forward.7
= control target key start
LH: loop header
LB: loop body
LE: loop exit
PB: predicated region body
PF: predicated region fallthrough
CT: control target
= control target key end

     0   :  { %18 = vsyncpa [#allocation3], 0  ;;  %v857_v3 = vmov 0   ;;  %v858_v46 = vmov 1983009808   ;;  %v119_v48 = vlaneseq  ;;  %s1196_s0 = inlined_call_operand.vmem [shape: f32[2,512], index: 0, kind: input, shape index: {}]   ;;  %s1197_s1 = inlined_call_operand.vmem [shape: f32[2,2], index: 1, kind: input, shape index: {}]   ;;  %s1198_s2 = inlined_call_operand.vmem [shape: f32[2,32], index: 2, kind: input, shape index: {}]   ;;  %s1199_s3 = inlined_call_operand.vmem [shape: f32[2,1], index: 3, kind: input, shape index: {}]   ;;  %s1200_s4 = inlined_call_operand.vmem [shape: f32[512,32], index: 4, kind: input, shape index: {}]   ;;  %s1201_s5 = inlined_call_operand.vmem [shape: f32[1,32], index: 5, kind: input, shape index: {}]   ;;  %s1202_s6 = inlined_call_operand.vmem [shape: f32[32,96], index: 6, kind: input, shape index: {}]   ;;  %s1203_s7 = inlined_call_operand.vmem [shape: f32[2,96], index: 7, kind: input, shape index: {}]   ;;  %s1204_s8 = inlined_call_operand.vmem [shape: f32[32,96], index: 8, kind: input, shape index: {}]   ;;  %s1205_s9 = inlined_call_operand.vmem [shape: f32[1,96], index: 9, kind: input, shape index: {}]   ;;  %s1206_s10 = inlined_call_operand.vmem [shape: f32[1,96], index: 10, kind: input, shape index: {}]   ;;  %s1207_s11 = inlined_call_operand.hbm [shape: f32[2,32], index: 11, kind: output, shape index: {0}]   ;;  %s1208_s12 = inlined_call_operand.hbm [shape: f32[2,32], index: 12, kind: output, shape index: {1}]  }
   0x1   :  { %v279_v0 = vld [vmem:[%s1199_s3] sm:$0x3]  ;;  %v60_v2 = vld [vmem:[%s1200_s4 + $0x88] sm:$0xff]  ;;  %801 = vset.pattern.permute.xlu0 %v857_v3  ;;  %v61_v14 = vld [vmem:[%s1200_s4 + $0x90] sm:$0xff]  ;;  %v117_v47 = vunpack.c.l.s4 %v858_v46 }
   0x2   :  { %v59_v1 = vld [vmem:[%s1200_s4 + $0x80] sm:$0xff]  ;;  %v44_v6 = vld [vmem:[%s1200_s4 + $0x8] sm:$0xff]  ;;  %282 = vperm.xlu0 %801, %v279_v0   ;;  %v62_v15 = vld [vmem:[%s1200_s4 + $0x98] sm:$0xff]  ;;  %v120_v63 = vshrl.u32 %v119_v48, 7 }
   0x3   :  { %v715_v4 = vpack.c.bf16 %v60_v2, %v59_v1  ;;  %v43_v5 = vld [vmem:[%s1200_s4] sm:$0xff]  ;;  %v92_v9 = vld [vmem:[%s1200_s4 + $0x188] sm:$0xff]  ;;  %v45_v16 = vld [vmem:[%s1200_s4 + $0x10] sm:$0xff]  ;;  %v719_v17 = vpack.c.bf16 %v62_v15, %v61_v14  ;;  %v118_v62 = vunpack.c.0.s8 %v117_v47 }
   0x4   :  { %v91_v7 = vld [vmem:[%s1200_s4 + $0x180] sm:$0xff]  ;;  %v717_v8 = vpack.c.bf16 %v44_v6, %v43_v5  ;;  %v76_v11 = vld [vmem:[%s1200_s4 + $0x108] sm:$0xff]  ;;  %v46_v18 = vld [vmem:[%s1200_s4 + $0x18] sm:$0xff] }
   0x5   :  { %v75_v10 = vld [vmem:[%s1200_s4 + $0x100] sm:$0xff]  ;;  %716 = vmatprep.subr.bf16.mxu0 %v715_v4  ;;  %v747_v12 = vpack.c.bf16 %v92_v9, %v91_v7  ;;  %v93_v19 = vld [vmem:[%s1200_s4 + $0x190] sm:$0xff]  ;;  %v94_v20 = vld [vmem:[%s1200_s4 + $0x198] sm:$0xff]  ;;  %v721_v21 = vpack.c.bf16 %v46_v18, %v45_v16 }
   0x6   :  { %v749_v13 = vpack.c.bf16 %v76_v11, %v75_v10  ;;  %718 = vmatpush3.bf16.msra.mxu0 %v717_v8  ;;  %v751_v22 = vpack.c.bf16 %v94_v20, %v93_v19  ;;  %v77_v23 = vld [vmem:[%s1200_s4 + $0x110] sm:$0xff]  ;;  %v78_v24 = vld [vmem:[%s1200_s4 + $0x118] sm:$0xff]  ;;  %v63_v25 = vld [vmem:[%s1200_s4 + $0xa0] sm:$0xff] }
   0x7   :  { %748 = vmatprep.subr.bf16.mxu1 %v747_v12  ;;  %720 = vmatprep.subr.bf16.mxu0 %v719_v17  ;;  %v753_v26 = vpack.c.bf16 %v78_v24, %v77_v23  ;;  %v64_v27 = vld [vmem:[%s1200_s4 + $0xa8] sm:$0xff]  ;;  %v47_v28 = vld [vmem:[%s1200_s4 + $0x20] sm:$0xff]  ;;  %v65_v37 = vld [vmem:[%s1200_s4 + $0xb0] sm:$0xff]  ;;  %v121_v12 = vsub.s32 %v118_v62, %v120_v63 }
   0x8   :  { %750 = vmatpush3.bf16.msra.mxu1 %v749_v13  ;;  %v48_v29 = vld [vmem:[%s1200_s4 + $0x28] sm:$0xff]  ;;  %v723_v30 = vpack.c.bf16 %v64_v27, %v63_v25  ;;  %v95_v31 = vld [vmem:[%s1200_s4 + $0x1a0] sm:$0xff]  ;;  %v66_v38 = vld [vmem:[%s1200_s4 + $0xb8] sm:$0xff] }
   0x9   :  { %752 = vmatprep.subr.bf16.mxu1 %v751_v22  ;;  %v96_v32 = vld [vmem:[%s1200_s4 + $0x1a8] sm:$0xff]  ;;  %v79_v33 = vld [vmem:[%s1200_s4 + $0x120] sm:$0xff]  ;;  %v725_v34 = vpack.c.bf16 %v48_v29, %v47_v28  ;;  %v727_v39 = vpack.c.bf16 %v66_v38, %v65_v37  ;;  %v49_v40 = vld [vmem:[%s1200_s4 + $0x30] sm:$0xff] }
   0xa   :  { %722 = vmatpush3.bf16.msra.mxu0 %v721_v21  ;;  %v755_v35 = vpack.c.bf16 %v96_v32, %v95_v31  ;;  %v80_v36 = vld [vmem:[%s1200_s4 + $0x128] sm:$0xff]  ;;  %v50_v41 = vld [vmem:[%s1200_s4 + $0x38] sm:$0xff]  ;;  %v97_v42 = vld [vmem:[%s1200_s4 + $0x1b0] sm:$0xff] }
   0xb   :  { %724 = vmatprep.subr.bf16.mxu0 %v723_v30  ;;  %v757_v43 = vpack.c.bf16 %v80_v36, %v79_v33  ;;  %v98_v44 = vld [vmem:[%s1200_s4 + $0x1b8] sm:$0xff]  ;;  %v81_v45 = vld [vmem:[%s1200_s4 + $0x130] sm:$0xff]  ;;  %v67_v51 = vld [vmem:[%s1200_s4 + $0xc0] sm:$0xff]  ;;  %v729_v53 = vpack.c.bf16 %v50_v41, %v49_v40 }
   0xc   :  { %754 = vmatpush3.bf16.msra.mxu1 %v753_v26  ;;  %v759_v49 = vpack.c.bf16 %v98_v44, %v97_v42  ;;  %v82_v50 = vld [vmem:[%s1200_s4 + $0x138] sm:$0xff]  ;;  %v68_v52 = vld [vmem:[%s1200_s4 + $0xc8] sm:$0xff]  ;;  %v99_v54 = vld [vmem:[%s1200_s4 + $0x1c0] sm:$0xff] }
   0xd   :  { %756 = vmatprep.subr.bf16.mxu1 %v755_v35  ;;  %v100_v55 = vld [vmem:[%s1200_s4 + $0x1c8] sm:$0xff]  ;;  %v731_v56 = vpack.c.bf16 %v68_v52, %v67_v51  ;;  %v51_v57 = vld [vmem:[%s1200_s4 + $0x40] sm:$0xff]  ;;  %v761_v59 = vpack.c.bf16 %v82_v50, %v81_v45  ;;  %v69_v60 = vld [vmem:[%s1200_s4 + $0xd0] sm:$0xff] }
   0xe   :  { %726 = vmatpush3.bf16.msra.mxu0 %v725_v34  ;;  %v52_v58 = vld [vmem:[%s1200_s4 + $0x48] sm:$0xff]  ;;  %v70_v61 = vld [vmem:[%s1200_s4 + $0xd8] sm:$0xff]  ;;  %v763_v0 = vpack.c.bf16 %v100_v55, %v99_v54  ;;  %v83_v1 = vld [vmem:[%s1200_s4 + $0x140] sm:$0xff] }
   0xf   :  { %728 = vmatprep.subr.bf16.mxu0 %v727_v39  ;;  %v84_v2 = vld [vmem:[%s1200_s4 + $0x148] sm:$0xff]  ;;  %v733_v3 = vpack.c.bf16 %v52_v58, %v51_v57  ;;  %v101_v4 = vld [vmem:[%s1200_s4 + $0x1d0] sm:$0xff]  ;;  %v102_v5 = vld [vmem:[%s1200_s4 + $0x1d8] sm:$0xff]  ;;  %v735_v6 = vpack.c.bf16 %v70_v61, %v69_v60 }
  0x10   :  { %758 = vmatpush3.bf16.msra.mxu1 %v757_v43  ;;  %v53_v7 = vld [vmem:[%s1200_s4 + $0x50] sm:$0xff]  ;;  %v54_v8 = vld [vmem:[%s1200_s4 + $0x58] sm:$0xff]  ;;  %v765_v9 = vpack.c.bf16 %v84_v2, %v83_v1  ;;  %v71_v10 = vld [vmem:[%s1200_s4 + $0xe0] sm:$0xff]  ;;  %v767_v13 = vpack.c.bf16 %v102_v5, %v101_v4 }
  0x11   :  { %760 = vmatprep.subr.bf16.mxu1 %v759_v49  ;;  %v72_v11 = vld [vmem:[%s1200_s4 + $0xe8] sm:$0xff]  ;;  %v85_v14 = vld [vmem:[%s1200_s4 + $0x150] sm:$0xff]  ;;  %v86_v15 = vld [vmem:[%s1200_s4 + $0x158] sm:$0xff]  ;;  %v737_v16 = vpack.c.bf16 %v54_v8, %v53_v7 }
  0x12   :  { %730 = vmatpush3.bf16.msra.mxu0 %v729_v53  ;;  %v103_v17 = vld [vmem:[%s1200_s4 + $0x1e0] sm:$0xff]  ;;  %v104_v18 = vld [vmem:[%s1200_s4 + $0x1e8] sm:$0xff]  ;;  %v739_v19 = vpack.c.bf16 %v72_v11, %v71_v10  ;;  %v769_v23 = vpack.c.bf16 %v86_v15, %v85_v14  ;;  %v73_v24 = vld [vmem:[%s1200_s4 + $0xf0] sm:$0xff] }
  0x13   :  { %732 = vmatprep.subr.bf16.mxu0 %v731_v56  ;;  %v55_v20 = vld [vmem:[%s1200_s4 + $0x60] sm:$0xff]  ;;  %v56_v21 = vld [vmem:[%s1200_s4 + $0x68] sm:$0xff]  ;;  %v74_v25 = vld [vmem:[%s1200_s4 + $0xf8] sm:$0xff]  ;;  %v771_v28 = vpack.c.bf16 %v104_v18, %v103_v17 }
  0x14   :  { %762 = vmatpush3.bf16.msra.mxu1 %v761_v59  ;;  %v42_v22 = vld [vmem:[%s1196_s0] sm:$0xff]  ;;  %v88_v30 = vld [vmem:[%s1200_s4 + $0x168] sm:$0xff]  ;;  %v741_v31 = vpack.c.bf16 %v56_v21, %v55_v20  ;;  %v105_v32 = vld [vmem:[%s1200_s4 + $0x1f0] sm:$0xff] }
  0x15   :  { %764 = vmatprep.subr.bf16.mxu1 %v763_v0  ;;  %v122_v26 = vrot.slane %v42_v22, %v121_v12  ;;  %v115_v27 = vcombine.high %v42_v22, %v42_v22  ;;  %v87_v29 = vld [vmem:[%s1200_s4 + $0x160] sm:$0xff]  ;;  %v106_v33 = vld [vmem:[%s1200_s4 + $0x1f8] sm:$0xff] }
  0x16   :  { %734 = vmatpush3.bf16.msra.mxu0 %v733_v3 }
  0x17   :  { %736 = vmatprep.subr.bf16.mxu0 %v735_v6  ;;  %v130_v34 = vcombine.high %v122_v26, %v122_v26  ;;  %v129_v35 = vrot.slane %v115_v27, %v121_v12 }
  0x18   :  { %766 = vmatpush3.bf16.msra.mxu1 %v765_v9 }
  0x19   :  { %768 = vmatprep.subr.bf16.mxu1 %v767_v13 }
  0x1a   :  { %738 = vmatpush3.bf16.msra.mxu0 %v737_v16 }
  0x1b   :  { %19 = vsyncpa [#allocation5], 0  ;;  %740 = vmatprep.subr.bf16.mxu0 %v739_v19  ;;  %v743_v36 = vpack.c.bf16 %v74_v25, %v73_v24  ;;  %v57_v37 = vld [vmem:[%s1200_s4 + $0x70] sm:$0xff]  ;;  %v58_v38 = vld [vmem:[%s1200_s4 + $0x78] sm:$0xff]  ;;  %v773_v39 = vpack.c.bf16 %v88_v30, %v87_v29  ;;  %200 = vmatprep.mubr.f32.mxu0 %v130_v34  ;;  %v131_v40 = vcombine.high %v129_v35, %v129_v35  ;;  %v859_v46 = vmov 0.0   ;;  %s862_s19 = smov 64  }
  0x1c   :  { %770 = vmatpush3.bf16.msra.mxu1 %v769_v23  ;;  %v775_v41 = vpack.c.bf16 %v106_v33, %v105_v32  ;;  %v89_v42 = vld [vmem:[%s1200_s4 + $0x170] sm:$0xff]  ;;  %v90_v43 = vld [vmem:[%s1200_s4 + $0x178] sm:$0xff]  ;;  %v745_v44 = vpack.c.bf16 %v58_v38, %v57_v37  ;;  %v290_v47 = vld [vmem:[%s1203_s7] sm:$0x3]  ;;  %vm295_vm0 = vcmask 1041408   ;;  %v860_v50 = vmov 0.0|0.0  }
  0x1d   :  { %772 = vmatprep.subr.bf16.mxu1 %v771_v28  ;;  %270 = vmatprep.mubr.f32.mxu1 %v131_v40  ;;  %v777_v45 = vpack.c.bf16 %v90_v43, %v89_v42  ;;  %v451_v48 = vld [vmem:[%s1204_s8] sm:$0xff]  ;;  %v452_v49 = vld [vmem:[%s1204_s8 + $0x8] sm:$0xff]  ;;  %vm861_vm1 = vmmov 0   ;;  %vm291_vm2 = vcmask 15360   ;;  %v453_v53 = vld [vmem:[%s1204_s8 + $0x10] sm:$0xff]  ;;  %vm369_vm3 = vcmask 261120  }
  0x1e   :  { %742 = vmatpush3.bf16.msra.mxu0 %v741_v31  ;;  %v277_v51 = vld [vmem:[%s1197_s1] sm:$0x3]  ;;  %v786_v52 = vpack.c.bf16 %v452_v49, %v451_v48  ;;  %v454_v54 = vld [vmem:[%s1204_s8 + $0x18] sm:$0xff]  ;;  %v287_v57 = vld [vmem:[%s1202_s6 + $0x8] sm:$0xff]  ;;  %s866_s4 = smov [#allocation4]   ;;  %vm568_vm4 = vcmask 254976  }
  0x1f   :  { %744 = vmatprep.subr.bf16.mxu0 %v743_v36  ;;  %v789_v55 = vpack.c.bf16 %v454_v54, %v453_v53  ;;  %v286_v56 = vld [vmem:[%s1202_s6] sm:$0xff]  ;;  %v288_v59 = vld [vmem:[%s1202_s6 + $0x10] sm:$0xff]  ;;  %v289_v60 = vld [vmem:[%s1202_s6 + $0x18] sm:$0xff]  ;;  %s587_s23 = sshll.u32 %s866_s4, 4  ;;  %s588_s23 = int_to_ptr.vmem [resolvable:$true] %s587_s23 }
  0x20   :  { %774 = vmatpush3.bf16.msra.mxu1 %v773_v39  ;;  %v780_v58 = vpack.c.bf16 %v287_v57, %v286_v56  ;;  %v783_v61 = vpack.c.bf16 %v289_v60, %v288_v59  ;;  %v278_v62 = vld [vmem:[%s1198_s2] sm:$0x3] }
  0x21   :  { %776 = vmatprep.subr.bf16.mxu1 %v775_v41  ;;  %v599_v2 = vld [vmem:[%s1201_s5] ss:$0 sm:$0xff]  ;;  %s863_s5 = smov 32  }
  0x22   :  { %746 = vmatpush3.bf16.msra.mxu0 %v745_v44  ;;  %v604_v13 = vld [vmem:[%s1206_s10] ss:$0 sm:$0xff]  ;;  %s864_s10 = smov 96  }
  0x23   :  { %688 = vmatprep.subr.mxu0 %v859_v46  ;;  %v603_v18 = vld [vmem:[%s1205_s9] ss:$0 sm:$0xff]  ;;  %s865_s9 = smov [#allocation2]  }
  0x24   :  { %778 = vmatpush3.bf16.msra.mxu1 %v777_v45  ;;  %s577_s22 = sshll.u32 %s865_s9, 4  ;;  %s578_s22 = int_to_ptr.vmem [resolvable:$true] %s577_s22 }
  0x25   :  { %201 = vmatmul.mubr.f32.vlgmr.msra.gmra.mrb[0].mxu0 %v122_v26  ;;  %779 = vmatprep.subr.bf16.mxu1 %v860_v50  ;;  %s809_s24 = scalar_lea.vmem %s578_s22, 32  ;;  %p814_p1 = scmp.lt.s32.totalorder %s578_s22, %s578_s22 }
  0x26   :  { %689 = vmatpush3.msk.msra.mxu0 %vm295_vm0, %v290_v47  ;;  %690 = vmatprep.mubr.msk.f32.mxu0 %vm861_vm1, %v859_v46  ;;  %p810_p0 = scmp.ne.s32.totalorder %s578_s22, %s809_s24  ;;  %p815_p2 = scmp.lt.s32.totalorder %s809_s24, %s809_s24 }
  0x27   :  { %271 = vmatmul.mubr.f32.vlgmr.msra.gmra.mrb[0].mxu1 %v129_v35  ;;  %785 = vmatprep.subr.bf16.mxu0 %v860_v50 }
  0x28   :  { %701 = vmatprep.mubr.msk.f32.mxu1 %vm861_vm1, %v859_v46  ;;  %781 = vmatpush3.bf16.msra.mxu1 %v780_v58  ;;  %p816_p3 = por %p815_p2, %p814_p1 }
  0x29   :  { %691 = vmatmul.mubr.msk.f32.vlgmr.msra.gmra.mrb[2].mxu0 %vm291_vm2, %v277_v51  ;;  %782 = vmatprep.subr.bf16.mxu1 %v860_v50 }
  0x2a   :  { %787 = vmatpush3.bf16.msra.mxu0 %v786_v52  ;;  %712 = vmatprep.mubr.msk.f32.mxu0 %vm861_vm1, %v859_v46  ;;  %p817_p4 = pnand %p816_p3, %p810_p0 }
  0x2b   :  { %788 = vmatprep.subr.bf16.mxu0 %v860_v50 }
  0x2c   :  { %784 = vmatpush3.bf16.msra.mxu1 %v783_v61 }
  0x2e   :  { %790 = vmatpush3.bf16.msra.mxu0 %v789_v55 }
  0x81   :  { %v283_v63 = vpop.permute.xlu0 %282 }
  0x82   :  { %v285_v0 = vmul.f32 %v283_v63, %v278_v62 }
  0x84   :  { %713 = vmatmul.mubr.msk.f32.vlgmr.msra.gmra.mrb[4].mxu0 %vm369_vm3, %v285_v0 }
  0xf8   :  { %v638_v1 = vpop.f32.mrb[0].mxu0 }
  0xf9   :  { %v639_v3 = vpop.f32.mrb[1].mxu0 }
  0xfa   :  { %v640_v4 = vadd.f32 %v639_v3, %v638_v1  ;;  %v673_v5 = vpop.f32.mrb[0].mxu1 }
  0xfb   :  { %v674_v6 = vpop.f32.mrb[1].mxu1 }
  0xfc   :  { %v203_v7 = vadd.f32 %v640_v4, %v599_v2  ;;  %v675_v8 = vadd.f32 %v674_v6, %v673_v5  ;;  %v365_v9 = vpop.f32.mrb[2].mxu0 }
  0xfd   :  { %v692_v10 = vpop.f32.mrb[3].mxu0 }
  0xfe   :  { %v273_v11 = vadd.f32 %v675_v8, %v203_v7 }
 0x100   :  { %v276_v12 = vmax.f32 %v273_v11, 0.0 }
 0x102   :  { %702 = vmatmul.mubr.msk.f32.vlgmr.msra.gmra.mrb[2].mxu1 %vm369_vm3, %v276_v12 }
 0x157   :  { %v531_v14 = vpop.f32.mrb[4].mxu0 }
 0x158   :  { %v532_v15 = vadd.f32 %v604_v13, %v531_v14  ;;  %v714_v16 = vpop.f32.mrb[5].mxu0 }
 0x15a   :  { %543 = vrot.lane.b32.xlu0 %v532_v15, %s862_s19 }
 0x15e   :  { %559 = vrot.lane.b32.xlu0 %v285_v0, %s863_s5 }
 0x1cc   :  { %v544_v28 = vpop.permute.xlu0 %543 }
 0x1d0   :  { %v560_v34 = vpop.permute.xlu0 %559 }
 0x1d5   :  { %v439_v17 = vpop.f32.mrb[2].mxu1 }
 0x1d6   :  { %v440_v19 = vadd.f32 %v439_v17, %v365_v9  ;;  %v703_v20 = vpop.f32.mrb[3].mxu1 }
 0x1d8   :  { %v450_v21 = vadd.f32 %v603_v18, %v440_v19 }
 0x1da   :  { %v535_v22 = vadd.f32 %v532_v15, %v450_v21 }
 0x1dc   :  { %v536_v23 = vsub.f32 0.0, %v535_v22 }
 0x1de   :  { %v537_v24 = vmul.f32 1.442695, %v536_v23 }
 0x1e0   :  { %803 = vpow2.f32 %v537_v24 }
 0x1ea   :  { %v804_v25 = vpop.eup %803 }
 0x1eb   :  { %v539_v26 = vadd.f32 1.0, %v804_v25 }
 0x1ed   :  { %805 = vrcp.f32 %v539_v26 }
 0x1f7   :  { %v806_v27 = vpop.eup %805 }
 0x1f8   :  { %v546_v29 = vmul.f32 %v806_v27, %v544_v28  ;;  %v553_v33 = vsub.f32 1.0, %v806_v27  ;;  %v562_v36 = vmul.f32 %v806_v27, %v560_v34 }
 0x1fa   :  { %548 = vrot.lane.b32.xlu1 %v546_v29, %s862_s19 }
 0x26c   :  { %v549_v30 = vpop.permute.xlu1 %548 }
 0x26d   :  { %v551_v31 = vadd.f32 %v549_v30, %v450_v21 }
 0x26f   :  { %807 = vtanh.f32 %v551_v31 }
 0x279   :  { %v808_v32 = vpop.eup %807 }
 0x27a   :  { %555 = vrot.lane.b32.xlu1 %v808_v32, %s864_s10 }
 0x2ec   :  { %v556_v35 = vpop.permute.xlu1 %555 }
 0x2ed   :  { %v558_v37 = vmul.f32 %v556_v35, %v553_v33 }
 0x2ef   :  { %v563_v38 = vadd.f32 %v562_v36, %v558_v37 }
 0x2f1   :  { %565 = vrot.lane.b32.xlu1 %v563_v38, %s864_s10 }
 0x363   :  { %v566_v39 = vpop.permute.xlu1 %565 }
 0x364   :  { %570 = vst.msk [vmem:[#allocation4] sm:$0x3] %vm568_vm4, %v566_v39  ;;  %569 = vst.msk [vmem:[#allocation2] sm:$0x3] %vm568_vm4, %v566_v39 }
 0x365   :  { %820 = shalt.err (!%p817_p4)
}
 0x366   :  { %s821_s0 = scalar_lea.hbm %s1207_s11, 32 }
 0x367   :  { %p822_p5 = scmp.ne.s32.totalorder %s1207_s11, %s821_s0  ;;  %p825_p6 = scmp.lt.u32.totalorder %s821_s0, %s1207_s11 }
 0x369   :  { %p827_p7 = pnand %p825_p6, %p822_p5 }
 0x36b   :  { %830 = shalt.err (!%p827_p7)
}
 0x36c   :  { %580 = dma.vmem_to_hbm [thread:$0]  %s578_s22, 32, %s1207_s11, [#allocation3]  }
 0x36d   :  { %s831_s3 = scalar_lea.vmem %s588_s23, 32  ;;  %p836_p9 = scmp.lt.s32.totalorder %s588_s23, %s588_s23 }
 0x36e   :  { %p832_p8 = scmp.ne.s32.totalorder %s588_s23, %s831_s3  ;;  %p837_p10 = scmp.lt.s32.totalorder %s831_s3, %s831_s3 }
 0x370   :  { %p838_p11 = por %p837_p10, %p836_p9 }
 0x372   :  { %p839_p12 = pnand %p838_p11, %p832_p8 }
 0x374   :  { %842 = shalt.err (!%p839_p12)
}
 0x375   :  { %s843_s14 = scalar_lea.hbm %s1208_s12, 32 }
 0x376   :  { %p844_p13 = scmp.ne.s32.totalorder %s1208_s12, %s843_s14  ;;  %p847_p0 = scmp.lt.u32.totalorder %s843_s14, %s1208_s12 }
 0x378   :  { %p849_p1 = pnand %p847_p0, %p844_p13 }
 0x37a   :  { %852 = shalt.err (!%p849_p1)
}
 0x37b   :  { %590 = dma.vmem_to_hbm [thread:$0]  %s588_s23, 32, %s1208_s12, [#allocation5]  }
 0x37c   :  { %853 = dma.done.wait [#allocation3], 32  }
 0x37d   :  { %854 = vsyncadd [#allocation3], 4294967264 }
 0x37e   :  { %855 = dma.done.wait [#allocation5], 32  }
 0x37f   :  { %856 = vsyncadd [#allocation5], 4294967264 }
 0x380   :  { %597 = vsyncpa [#allocation3], 1 }
 0x381   :  { %598 = vsyncpa [#allocation5], 1 }

</bundles_post_ra>
